<compile_context>
chip_gen: v7x
topology: tpu7x:2x2x1
jax: 0.10.0
libtpu: 0.0.40
codegen_flags: <defaults>
</compile_context>

<pallas_src>
import functools

import jax
import jax.numpy as jnp
from jax import lax
from jax.experimental import pallas as pl
from jax.experimental.pallas import tpu as pltpu


# ----------------------------- helper utilities -----------------------------

def _round_up(x, m):
    return ((x + m - 1) // m) * m


def _vmem_limit_bytes():
    """Generation-aware scoped-VMEM budget (v7x has 64 MiB, v5e/v6e 128 MiB)."""
    try:
        cap = pltpu.get_tpu_info().vmem_capacity_bytes
        return min(int(cap * 3 // 4), 96 * 1024 * 1024)
    except Exception:
        return 48 * 1024 * 1024


_VMEM_LIMIT = _vmem_limit_bytes()


def _cparams(n_axes):
    return pltpu.CompilerParams(
        dimension_semantics=("parallel",) * n_axes,
        vmem_limit_bytes=_VMEM_LIMIT)


def _pinned(shape):
    return pl.BlockSpec(shape, lambda i: tuple(0 for _ in shape))


def _row_tiling(m, target):
    """Return (row_tile, padded_rows).

    Largest multiple-of-8 divisor of m that is <= target and >= 128; otherwise
    pad m up to a multiple of `target` (tail rows are zero-padded and sliced
    off by the caller).  Never degenerates to tiny tiles.
    """
    if m <= target:
        return m, m
    for d in range(min(m, target), 127, -1):
        if m % d == 0 and d % 8 == 0:
            return d, m
    return target, _round_up(m, target)


# -------------------- kernel 1: self-attn + norm2 + samp proj ---------------

def _sa_kernel(tgt_ref, pos_ref, wqk_ref, bqk_ref, wv_ref, bv_ref,
               wo_ref, bo_ref, ln_g_ref, ln_b_ref, wsp_ref, bsp_ref,
               tgt2_ref, sp_ref, *, n_heads, eps):
    x = tgt_ref[0]                       # (Lq, D) f32
    pos = pos_ref[0]
    Lq, D = x.shape
    hd = D // n_heads
    scale = 1.0 / (hd ** 0.5)

    # fused QK projection (q,k share input tgt+pos); V projection uses tgt only.
    qk = jnp.dot((x + pos).astype(jnp.bfloat16), wqk_ref[...],
                 preferred_element_type=jnp.float32) + bqk_ref[...]     # (Lq, 2D)
    v = jnp.dot(x.astype(jnp.bfloat16), wv_ref[...],
                preferred_element_type=jnp.float32) + bv_ref[...]       # (Lq, D)
    wo = wo_ref[...]                                                    # (D, D) bf16

    # per-head attention; each head's output is contracted straight into the
    # output projection (no concat / relayout).  Matmuls are bf16 on the MXU
    # with f32 accumulation; softmax stays f32 on the VPU.
    acc = jnp.zeros((Lq, D), jnp.float32)
    for h in range(n_heads):
        qh = qk[:, h * hd:(h + 1) * hd].astype(jnp.bfloat16)
        kh = qk[:, D + h * hd:D + (h + 1) * hd].astype(jnp.bfloat16)
        vh = v[:, h * hd:(h + 1) * hd].astype(jnp.bfloat16)
        s = lax.dot_general(qh, kh, (((1,), (1,)), ((), ())),
                            preferred_element_type=jnp.float32) * scale  # (Lq, Lq)
        s = s - jnp.max(s, axis=-1, keepdims=True)
        p = jnp.exp(s)
        p = p * pl.reciprocal(jnp.sum(p, axis=-1, keepdims=True), approx=True)
        oh = jnp.dot(p.astype(jnp.bfloat16), vh,
                     preferred_element_type=jnp.float32)                 # (Lq, hd)
        acc = acc + jnp.dot(oh.astype(jnp.bfloat16), wo[h * hd:(h + 1) * hd, :],
                            preferred_element_type=jnp.float32)

    t = x + acc + bo_ref[...]                                            # residual
    mu = jnp.mean(t, axis=-1, keepdims=True)
    d = t - mu
    var = jnp.mean(d * d, axis=-1, keepdims=True)
    y = d * lax.rsqrt(var + eps) * ln_g_ref[...] + ln_b_ref[...]         # norm2
    tgt2_ref[0] = y.astype(tgt2_ref.dtype)

    # fused sampling-offset + attention-logit projection of (tgt2 + query_pos).
    # kept f32 (offsets feed sampling coordinates); output is lane-dense padded.
    sp = jnp.dot(y + pos, wsp_ref[...],
                 preferred_element_type=jnp.float32) + bsp_ref[...]
    sp_ref[0] = sp.astype(sp_ref.dtype)


def self_attn_norm_sp(p, tgt, query_pos, n_heads, eps=1e-5):
    N, Lq, D = tgt.shape
    SP = p['ca_sp_w'].shape[1]
    SPp = _round_up(SP, 128)                       # lane-dense output (unmasked vst)
    w_sp, b_sp = p['ca_sp_w'], p['ca_sp_b']
    if SPp != SP:
        w_sp = jnp.pad(w_sp, ((0, 0), (0, SPp - SP)))
        b_sp = jnp.pad(b_sp, ((0, SPp - SP),))
    kern = functools.partial(_sa_kernel, n_heads=n_heads, eps=eps)
    seq_spec = pl.BlockSpec((1, Lq, D), lambda i: (i, 0, 0))
    tgt2, sp = pl.pallas_call(
        kern,
        out_shape=(jax.ShapeDtypeStruct((N, Lq, D), tgt.dtype),
                   jax.ShapeDtypeStruct((N, Lq, SPp), tgt.dtype)),
        grid=(N,),
        in_specs=[seq_spec, seq_spec,
                  _pinned((D, 2 * D)), _pinned((1, 2 * D)),
                  _pinned((D, D)), _pinned((1, D)),
                  _pinned((D, D)), _pinned((1, D)),
                  _pinned((1, D)), _pinned((1, D)),
                  _pinned((D, SPp)), _pinned((1, SPp))],
        out_specs=(seq_spec, pl.BlockSpec((1, Lq, SPp), lambda i: (i, 0, 0))),
        compiler_params=_cparams(1),
    )(tgt, query_pos,
      p['sa_wqk'].astype(jnp.bfloat16), p['sa_bqk'].reshape(1, 2 * D),
      p['sa_wv'].astype(jnp.bfloat16), p['sa_bv'].reshape(1, D),
      p['sa_wo'].astype(jnp.bfloat16), p['sa_bo'].reshape(1, D),
      p['ln2_g'].reshape(1, D), p['ln2_b'].reshape(1, D),
      w_sp, b_sp.reshape(1, SPp))
    return tgt2, sp[..., :SP]


# ---------------- kernel 2 / 4: row-tiled linear and fused FFN ---------------

def _linear_kernel(x_ref, w_ref, b_ref, o_ref):
    o_ref[...] = (jnp.dot(x_ref[...].astype(jnp.bfloat16), w_ref[...],
                          preferred_element_type=jnp.float32)
                  + b_ref[...]).astype(o_ref.dtype)


def linear_rowtiled(x, w, b, *, out_dtype=None, target_rows=512):
    M, K = x.shape
    Nout = w.shape[1]
    out_dtype = out_dtype or x.dtype
    bm, Mp = _row_tiling(M, target_rows)
    xp = x if Mp == M else jnp.pad(x, ((0, Mp - M), (0, 0)))
    out = pl.pallas_call(
        _linear_kernel,
        out_shape=jax.ShapeDtypeStruct((Mp, Nout), out_dtype),
        grid=(Mp // bm,),
        in_specs=[pl.BlockSpec((bm, K), lambda i: (i, 0)),
                  _pinned((K, Nout)), _pinned((1, Nout))],
        out_specs=pl.BlockSpec((bm, Nout), lambda i: (i, 0)),
        compiler_params=_cparams(1),
    )(xp, w.astype(jnp.bfloat16), b.reshape(1, Nout))
    return out if Mp == M else out[:M]


def _ffn_kernel(x_ref, w1_ref, b1_ref, w2_ref, b2_ref, g_ref, be_ref, o_ref, *, eps):
    x = x_ref[...].astype(jnp.float32)
    h = jnp.dot(x.astype(jnp.bfloat16), w1_ref[...],
                preferred_element_type=jnp.float32) + b1_ref[...]
    h = jnp.maximum(h, 0.0)                                  # relu
    y = jnp.dot(h.astype(jnp.bfloat16), w2_ref[...],
                preferred_element_type=jnp.float32) + b2_ref[...]
    t = x + y                                                # residual
    mu = jnp.mean(t, axis=-1, keepdims=True)
    d = t - mu
    var = jnp.mean(d * d, axis=-1, keepdims=True)
    o_ref[...] = (d * lax.rsqrt(var + eps) * g_ref[...] + be_ref[...]).astype(o_ref.dtype)


def ffn_block(x, w1, b1, w2, b2, gamma, beta, eps=1e-5, target_rows=256):
    M, D = x.shape
    F_ = w1.shape[1]
    bm, Mp = _row_tiling(M, target_rows)
    xp = x if Mp == M else jnp.pad(x, ((0, Mp - M), (0, 0)))
    kern = functools.partial(_ffn_kernel, eps=eps)
    out = pl.pallas_call(
        kern,
        out_shape=jax.ShapeDtypeStruct((Mp, D), x.dtype),
        grid=(Mp // bm,),
        in_specs=[pl.BlockSpec((bm, D), lambda i: (i, 0)),
                  _pinned((D, F_)), _pinned((1, F_)),
                  _pinned((F_, D)), _pinned((1, D)),
                  _pinned((1, D)), _pinned((1, D))],
        out_specs=pl.BlockSpec((bm, D), lambda i: (i, 0)),
        compiler_params=_cparams(1),
    )(xp, w1.astype(jnp.bfloat16), b1.reshape(1, F_), w2.astype(jnp.bfloat16),
      b2.reshape(1, D), gamma.reshape(1, D), beta.reshape(1, D))
    return out if Mp == M else out[:M]


# ------- kernel 3: bilinear sample + softmax aggregate + out-proj + norm1 ----

def _ca_kernel(val_ref, sx_ref, sy_ref, logit_ref, res_ref,
               wo_ref, bo_ref, g_ref, be_ref, o_ref, *,
               spatial_shapes, n_heads, n_points, eps):
    Lq = res_ref.shape[1]
    D = res_ref.shape[2]
    H = n_heads
    hd = D // H
    L = len(spatial_shapes)
    P = n_points
    LP = L * P

    logits = logit_ref[0]                                    # (Lq, H*L*P) f32
    sx = sx_ref[0]                                           # (Lq, H*L*P) pixel x
    sy = sy_ref[0]                                           # (Lq, H*L*P) pixel y

    # per-head softmax over (levels x points) — stays f32 on the VPU
    a = []
    for h in range(H):
        ah = logits[:, h * LP:(h + 1) * LP]
        ah = ah - jnp.max(ah, axis=-1, keepdims=True)
        ah = jnp.exp(ah)
        ah = ah * pl.reciprocal(jnp.sum(ah, axis=-1, keepdims=True), approx=True)
        a.append(ah)

    # bilinear sampling as a (Lq, Len_l) interpolation matrix per (level, head):
    # the attention weight is folded into the corner weights, so the point axis
    # collapses inside the scatter (no per-point row slices, P-fold fewer MXU
    # rows) and the matmul runs bf16 on the MXU with f32 accumulation.
    # TODO(synk): for production Len_l (thousands) replace the one-hot build
    #             with a DMA row-gather of the 4 corner rows per sample.
    outs = [jnp.zeros((Lq, hd), jnp.float32) for _ in range(H)]
    start = 0
    for l, (Hl, Wl) in enumerate(spatial_shapes):
        Len_l = Hl * Wl
        v_l = val_ref[0, start:start + Len_l, :]             # (Len_l, D) bf16
        lane = lax.broadcasted_iota(jnp.int32, (Lq, Len_l), 1)  # hoisted per level
        for h in range(H):
            wt = jnp.zeros((Lq, Len_l), jnp.float32)
            for pt in range(P):
                c0 = (h * L + l) * P + pt
                gx = sx[:, c0:c0 + 1]                        # (Lq, 1)
                gy = sy[:, c0:c0 + 1]
                x0 = jnp.floor(gx)
                y0 = jnp.floor(gy)
                fx = gx - x0
                fy = gy - y0
                ap = a[h][:, l * P + pt:l * P + pt + 1]      # attention weight
                for cx, cy, cw in ((x0,       y0,       (1 - fx) * (1 - fy)),
                                   (x0 + 1.0, y0,       fx * (1 - fy)),
                                   (x0,       y0 + 1.0, (1 - fx) * fy),
                                   (x0 + 1.0, y0 + 1.0, fx * fy)):
                    valid = (cx >= 0) & (cx < Wl) & (cy >= 0) & (cy < Hl)
                    xi = jnp.clip(cx, 0, Wl - 1).astype(jnp.int32)
                    yi = jnp.clip(cy, 0, Hl - 1).astype(jnp.int32)
                    idx = yi * Wl + xi                       # (Lq, 1) flat index
                    w = jnp.where(valid, cw, 0.0) * ap       # zeros padding mode
                    wt = wt + jnp.where(lane == idx, w, 0.0)
            # gather-as-matmul on the MXU: (Lq, Len_l) @ (Len_l, hd)
            outs[h] = outs[h] + jnp.dot(wt.astype(jnp.bfloat16),
                                        v_l[:, h * hd:(h + 1) * hd],
                                        preferred_element_type=jnp.float32)
        start += Len_l

    # fold the head concat into the output projection (no relayout)
    wo = wo_ref[...]                                         # (D, D) bf16
    acc = jnp.zeros((Lq, D), jnp.float32)
    for h in range(H):
        acc = acc + jnp.dot(outs[h].astype(jnp.bfloat16), wo[h * hd:(h + 1) * hd, :],
                            preferred_element_type=jnp.float32)

    t = res_ref[0] + acc + bo_ref[...]                       # residual
    mu = jnp.mean(t, axis=-1, keepdims=True)
    d = t - mu
    var = jnp.mean(d * d, axis=-1, keepdims=True)
    o_ref[0] = (d * lax.rsqrt(var + eps) * g_ref[...] + be_ref[...]).astype(o_ref.dtype)


def deform_attn_norm(value, samp_x, samp_y, logits, residual,
                     w_out, b_out, gamma, beta, spatial_shapes,
                     n_heads, n_points, eps=1e-5):
    N, Len_in, D = value.shape
    Lq = residual.shape[1]
    HLP = logits.shape[-1]
    kern = functools.partial(_ca_kernel, spatial_shapes=tuple(spatial_shapes),
                             n_heads=n_heads, n_points=n_points, eps=eps)
    hlp_spec = pl.BlockSpec((1, Lq, HLP), lambda i: (i, 0, 0))
    seq_spec = pl.BlockSpec((1, Lq, D), lambda i: (i, 0, 0))
    return pl.pallas_call(
        kern,
        out_shape=jax.ShapeDtypeStruct((N, Lq, D), residual.dtype),
        grid=(N,),
        in_specs=[pl.BlockSpec((1, Len_in, D), lambda i: (i, 0, 0)),  # bf16 value
                  hlp_spec, hlp_spec, hlp_spec, seq_spec,
                  _pinned((D, D)), _pinned((1, D)),
                  _pinned((1, D)), _pinned((1, D))],
        out_specs=seq_spec,
        compiler_params=_cparams(1),
    )(value, samp_x, samp_y, logits, residual,
      w_out.astype(jnp.bfloat16), b_out.reshape(1, D),
      gamma.reshape(1, D), beta.reshape(1, D))


# ------------------------------- JAX glue -----------------------------------

def decoder_layer_forward(p, tgt, query_pos, reference_points, src,
                          spatial_shapes, level_start_index,
                          n_heads, n_levels, n_points):
    del level_start_index  # static spatial_shapes carry the level splits
    N, Lq, D = tgt.shape
    H, L, P = n_heads, n_levels, n_points
    HLP = H * L * P

    # (1) fused self-attention + residual + norm2, plus offset/logit projection
    tgt2, sp = self_attn_norm_sp(p, tgt, query_pos, n_heads)

    # (2) sampling locations (also a layer output) — cheap elementwise JAX.
    offsets = sp[..., :2 * HLP].reshape(N, Lq, H, L, P, 2)
    logits = sp[..., 2 * HLP:]                               # (N, Lq, HLP)
    normalizer = jnp.array([[w, h] for (h, w) in spatial_shapes], jnp.float32)
    sampling_locations = (reference_points[:, :, None, :, None, :]
                          + offsets / normalizer[None, None, None, :, None, :])

    # pre-scale to per-level pixel coordinates (grid_sample, align_corners=False,
    # zeros padding); kept lane-dense (N, Lq, H*L*P) — corner math runs in-kernel.
    Ws = jnp.array([w for (_, w) in spatial_shapes], jnp.float32)
    Hs = jnp.array([h for (h, _) in spatial_shapes], jnp.float32)
    gx = sampling_locations[..., 0] * Ws[None, None, None, :, None] - 0.5
    gy = sampling_locations[..., 1] * Hs[None, None, None, :, None] - 0.5
    samp_x = gx.reshape(N, Lq, HLP).astype(jnp.float32)
    samp_y = gy.reshape(N, Lq, HLP).astype(jnp.float32)

    # (3) value projection over all memory tokens (bf16 in/out, row-tiled, pipelined)
    Len_in = src.shape[1]
    value = linear_rowtiled(src.astype(jnp.bfloat16).reshape(N * Len_in, D),
                            p['ca_val_w'], p['ca_val_b'],
                            out_dtype=jnp.bfloat16).reshape(N, Len_in, D)

    # (4) fused bilinear sampling + level/point softmax aggregation
    #     + output projection + residual + norm1
    tgt3 = deform_attn_norm(value, samp_x, samp_y, logits, tgt2,
                            p['ca_out_w'], p['ca_out_b'],
                            p['ln1_g'], p['ln1_b'],
                            spatial_shapes, n_heads, n_points)

    # (5) FFN: linear1 -> relu -> linear2 -> residual -> norm3 (row-tiled, fused)
    out = ffn_block(tgt3.reshape(N * Lq, D), p['ff_w1'], p['ff_b1'],
                    p['ff_w2'], p['ff_b2'], p['ln3_g'], p['ln3_b']).reshape(N, Lq, D)
    return out, sampling_locations


# ----------------------------- parameter init -------------------------------

def init_params(key, d_model, d_ffn, n_heads, n_levels, n_points):
    ks = jax.random.split(key, 12)

    def w(k, shape, scale=0.05):
        return (scale * jax.random.normal(k, shape)).astype(jnp.float32)

    HLP = n_heads * n_levels * n_points
    z = lambda n: jnp.zeros((n,), jnp.float32)
    o = lambda n: jnp.ones((n,), jnp.float32)
    off_w = w(ks[4], (d_model, HLP * 2))
    off_b = (0.2 * jax.random.normal(ks[5], (HLP * 2,))).astype(jnp.float32)
    attn_w = w(ks[6], (d_model, HLP))
    attn_b = z(HLP)
    return dict(
        # self-attention (weights stored (in, out)); q/k projections fused
        sa_wqk=jnp.concatenate([w(ks[0], (d_model, d_model)),
                                w(ks[1], (d_model, d_model))], axis=1),
        sa_bqk=z(2 * d_model),
        sa_wv=w(ks[2], (d_model, d_model)), sa_bv=z(d_model),
        sa_wo=w(ks[3], (d_model, d_model)), sa_bo=z(d_model),
        ln2_g=o(d_model), ln2_b=z(d_model),
        # MSDeformAttn: sampling-offset and attention-weight projections fused
        ca_sp_w=jnp.concatenate([off_w, attn_w], axis=1),
        ca_sp_b=jnp.concatenate([off_b, attn_b], axis=0),
        ca_val_w=w(ks[7], (d_model, d_model)), ca_val_b=z(d_model),
        ca_out_w=w(ks[8], (d_model, d_model)), ca_out_b=z(d_model),
        ln1_g=o(d_model), ln1_b=z(d_model),
        # FFN
        ff_w1=w(ks[9], (d_model, d_ffn)), ff_b1=z(d_ffn),
        ff_w2=w(ks[10], (d_ffn, d_model)), ff_b2=z(d_model),
        ln3_g=o(d_model), ln3_b=z(d_model),
    )


# --------------------------------- main --------------------------------------

if __name__ == "__main__":
    d_model, d_ffn = 64, 128
    n_heads, n_levels, n_points = 4, 2, 2
    N, Lq = 2, 8
    spatial_shapes = ((8, 8), (4, 4))           # static per-level (H, W)
    Len_in = sum(h * w for h, w in spatial_shapes)
    level_start_index = jnp.array([0, spatial_shapes[0][0] * spatial_shapes[0][1]],
                                  jnp.int32)

    key = jax.random.PRNGKey(0)
    k1, k2, k3, k4, kp = jax.random.split(key, 5)
    tgt = jax.random.normal(k1, (N, Lq, d_model), jnp.float32)
    query_pos = jax.random.normal(k2, (N, Lq, d_model), jnp.float32)
    reference_points = jax.random.uniform(k3, (N, Lq, n_levels, 2), jnp.float32,
                                          minval=0.1, maxval=0.9)
    src = jax.random.normal(k4, (N, Len_in, d_model), jnp.float32)

    params = init_params(kp, d_model, d_ffn, n_heads, n_levels, n_points)

    out, sampled_points = decoder_layer_forward(
        params, tgt, query_pos, reference_points, src,
        spatial_shapes, level_start_index, n_heads, n_levels, n_points)

    jax.block_until_ready(out)
    jax.block_until_ready(sampled_points)
    assert out.shape == (N, Lq, d_model)
    assert sampled_points.shape == (N, Lq, n_heads, n_levels, n_points, 2)
    print("KERNEL_OK")
</pallas_src>

<mosaic_0001>
module attributes {stable_mosaic.version = 11 : i64} {
  func.func @_sa_kernel(%arg0: i32, %arg1: memref<1x8x64xf32, #tpu.memory_space<vmem>>, %arg2: memref<1x8x64xf32, #tpu.memory_space<vmem>>, %arg3: memref<64x128xbf16, #tpu.memory_space<vmem>>, %arg4: memref<1x128xf32, #tpu.memory_space<vmem>>, %arg5: memref<64x64xbf16, #tpu.memory_space<vmem>>, %arg6: memref<1x64xf32, #tpu.memory_space<vmem>>, %arg7: memref<64x64xbf16, #tpu.memory_space<vmem>>, %arg8: memref<1x64xf32, #tpu.memory_space<vmem>>, %arg9: memref<1x64xf32, #tpu.memory_space<vmem>>, %arg10: memref<1x64xf32, #tpu.memory_space<vmem>>, %arg11: memref<64x128xf32, #tpu.memory_space<vmem>>, %arg12: memref<1x128xf32, #tpu.memory_space<vmem>>, %arg13: memref<1x8x64xf32, #tpu.memory_space<vmem>>, %arg14: memref<1x8x128xf32, #tpu.memory_space<vmem>>) attributes {dimension_semantics = [#tpu.dimension_semantics<parallel>], iteration_bounds = array<i64: 2>, scalar_prefetch = 0 : i64, scratch_operands = 0 : i64, tpu.core_type = #tpu.core_type<tc>, window_params = [{transform_indices = @transform_0, window_bounds = array<i64: 1, 8, 64>}, {transform_indices = @transform_1, window_bounds = array<i64: 1, 8, 64>}, {pipeline_mode = #tpu.pipeline_mode<synchronous>, transform_indices = @transform_2, window_bounds = array<i64: 64, 128>}, {pipeline_mode = #tpu.pipeline_mode<synchronous>, transform_indices = @transform_3, window_bounds = array<i64: 1, 128>}, {pipeline_mode = #tpu.pipeline_mode<synchronous>, transform_indices = @transform_4, window_bounds = array<i64: 64, 64>}, {pipeline_mode = #tpu.pipeline_mode<synchronous>, transform_indices = @transform_5, window_bounds = array<i64: 1, 64>}, {pipeline_mode = #tpu.pipeline_mode<synchronous>, transform_indices = @transform_6, window_bounds = array<i64: 64, 64>}, {pipeline_mode = #tpu.pipeline_mode<synchronous>, transform_indices = @transform_7, window_bounds = array<i64: 1, 64>}, {pipeline_mode = #tpu.pipeline_mode<synchronous>, transform_indices = @transform_8, window_bounds = array<i64: 1, 64>}, {pipeline_mode = #tpu.pipeline_mode<synchronous>, transform_indices = @transform_9, window_bounds = array<i64: 1, 64>}, {pipeline_mode = #tpu.pipeline_mode<synchronous>, transform_indices = @transform_10, window_bounds = array<i64: 64, 128>}, {pipeline_mode = #tpu.pipeline_mode<synchronous>, transform_indices = @transform_11, window_bounds = array<i64: 1, 128>}, {transform_indices = @transform_12, window_bounds = array<i64: 1, 8, 64>}, {transform_indices = @transform_13, window_bounds = array<i64: 1, 8, 128>}]} {
    %c0 = arith.constant 0 : index
    %c0_0 = arith.constant 0 : index
    %c0_1 = arith.constant 0 : index
    %0 = vector.load %arg1[%c0, %c0_0, %c0_1] : memref<1x8x64xf32, #tpu.memory_space<vmem>>, vector<1x8x64xf32>
    %1 = vector.shape_cast %0 : vector<1x8x64xf32> to vector<8x64xf32>
    %c0_2 = arith.constant 0 : index
    %c0_3 = arith.constant 0 : index
    %c0_4 = arith.constant 0 : index
    %2 = vector.load %arg2[%c0_2, %c0_3, %c0_4] : memref<1x8x64xf32, #tpu.memory_space<vmem>>, vector<1x8x64xf32>
    %3 = vector.shape_cast %2 : vector<1x8x64xf32> to vector<8x64xf32>
    %4 = arith.addf %1, %3 : vector<8x64xf32>
    %5 = arith.truncf %4 : vector<8x64xf32> to vector<8x64xbf16>
    %c0_5 = arith.constant 0 : index
    %c0_6 = arith.constant 0 : index
    %6 = vector.load %arg3[%c0_5, %c0_6] : memref<64x128xbf16, #tpu.memory_space<vmem>>, vector<64x128xbf16>
    %cst = arith.constant dense<0.000000e+00> : vector<8x128xf32>
    %7 = tpu.matmul %5, %6, %cst {dimension_numbers = #tpu.dot_dimension_numbers<[1], [0], [0], [1], [0, 0, 1, 1], [], []>} : vector<8x64xbf16>, vector<64x128xbf16>, vector<8x128xf32> -> vector<8x128xf32>
    %c0_7 = arith.constant 0 : index
    %c0_8 = arith.constant 0 : index
    %8 = vector.load %arg4[%c0_7, %c0_8] : memref<1x128xf32, #tpu.memory_space<vmem>>, vector<1x128xf32>
    %9 = vector.broadcast %8 : vector<1x128xf32> to vector<8x128xf32>
    %10 = arith.addf %7, %9 : vector<8x128xf32>
    %11 = arith.truncf %1 : vector<8x64xf32> to vector<8x64xbf16>
    %c0_9 = arith.constant 0 : index
    %c0_10 = arith.constant 0 : index
    %12 = vector.load %arg5[%c0_9, %c0_10] : memref<64x64xbf16, #tpu.memory_space<vmem>>, vector<64x64xbf16>
    %cst_11 = arith.constant dense<0.000000e+00> : vector<8x64xf32>
    %13 = tpu.matmul %11, %12, %cst_11 {dimension_numbers = #tpu.dot_dimension_numbers<[1], [0], [0], [1], [0, 0, 1, 1], [], []>} : vector<8x64xbf16>, vector<64x64xbf16>, vector<8x64xf32> -> vector<8x64xf32>
    %c0_12 = arith.constant 0 : index
    %c0_13 = arith.constant 0 : index
    %14 = vector.load %arg6[%c0_12, %c0_13] : memref<1x64xf32, #tpu.memory_space<vmem>>, vector<1x64xf32>
    %15 = vector.broadcast %14 : vector<1x64xf32> to vector<8x64xf32>
    %16 = arith.addf %13, %15 : vector<8x64xf32>
    %c0_14 = arith.constant 0 : index
    %c0_15 = arith.constant 0 : index
    %17 = vector.load %arg7[%c0_14, %c0_15] : memref<64x64xbf16, #tpu.memory_space<vmem>>, vector<64x64xbf16>
    %cst_16 = arith.constant 0.000000e+00 : f32
    %18 = vector.broadcast %cst_16 : f32 to vector<8x64xf32>
    %19 = vector.extract_strided_slice %10 {offsets = [0, 0], sizes = [8, 16], strides = [1, 1]} : vector<8x128xf32> to vector<8x16xf32>
    %20 = arith.truncf %19 : vector<8x16xf32> to vector<8x16xbf16>
    %21 = vector.extract_strided_slice %10 {offsets = [0, 64], sizes = [8, 16], strides = [1, 1]} : vector<8x128xf32> to vector<8x16xf32>
    %22 = arith.truncf %21 : vector<8x16xf32> to vector<8x16xbf16>
    %23 = vector.extract_strided_slice %16 {offsets = [0, 0], sizes = [8, 16], strides = [1, 1]} : vector<8x64xf32> to vector<8x16xf32>
    %24 = arith.truncf %23 : vector<8x16xf32> to vector<8x16xbf16>
    %cst_17 = arith.constant dense<0.000000e+00> : vector<8x8xf32>
    %25 = tpu.matmul %20, %22, %cst_17 {dimension_numbers = #tpu.dot_dimension_numbers<[1], [1], [0], [0], [0, 0, 1, 0], [], []>} : vector<8x16xbf16>, vector<8x16xbf16>, vector<8x8xf32> -> vector<8x8xf32>
    %cst_18 = arith.constant 2.500000e-01 : f32
    %26 = vector.broadcast %cst_18 : f32 to vector<8x8xf32>
    %27 = arith.mulf %25, %26 : vector<8x8xf32>
    %cst_19 = arith.constant dense<0xFF800000> : vector<8xf32>
    %28 = vector.multi_reduction <maximumf>, %27, %cst_19 [1] : vector<8x8xf32> to vector<8xf32>
    %29 = vector.shape_cast %28 : vector<8xf32> to vector<8x1xf32>
    %30 = vector.broadcast %29 : vector<8x1xf32> to vector<8x8xf32>
    %31 = arith.subf %27, %30 : vector<8x8xf32>
    %32 = math.exp %31 : vector<8x8xf32>
    %cst_20 = arith.constant dense<0.000000e+00> : vector<8xf32>
    %33 = vector.multi_reduction <add>, %32, %cst_20 [1] : vector<8x8xf32> to vector<8xf32>
    %34 = vector.shape_cast %33 : vector<8xf32> to vector<8x1xf32>
    %35 = tpu.reciprocal %34 {approx = true} : vector<8x1xf32> -> vector<8x1xf32>
    %36 = vector.broadcast %35 : vector<8x1xf32> to vector<8x8xf32>
    %37 = arith.mulf %32, %36 : vector<8x8xf32>
    %38 = arith.truncf %37 : vector<8x8xf32> to vector<8x8xbf16>
    %cst_21 = arith.constant dense<0.000000e+00> : vector<8x16xf32>
    %39 = tpu.matmul %38, %24, %cst_21 {dimension_numbers = #tpu.dot_dimension_numbers<[1], [0], [0], [1], [0, 0, 1, 1], [], []>} : vector<8x8xbf16>, vector<8x16xbf16>, vector<8x16xf32> -> vector<8x16xf32>
    %40 = arith.truncf %39 : vector<8x16xf32> to vector<8x16xbf16>
    %41 = vector.extract_strided_slice %17 {offsets = [0, 0], sizes = [16, 64], strides = [1, 1]} : vector<64x64xbf16> to vector<16x64xbf16>
    %cst_22 = arith.constant dense<0.000000e+00> : vector<8x64xf32>
    %42 = tpu.matmul %40, %41, %cst_22 {dimension_numbers = #tpu.dot_dimension_numbers<[1], [0], [0], [1], [0, 0, 1, 1], [], []>} : vector<8x16xbf16>, vector<16x64xbf16>, vector<8x64xf32> -> vector<8x64xf32>
    %43 = arith.addf %18, %42 : vector<8x64xf32>
    %44 = vector.extract_strided_slice %10 {offsets = [0, 16], sizes = [8, 16], strides = [1, 1]} : vector<8x128xf32> to vector<8x16xf32>
    %45 = arith.truncf %44 : vector<8x16xf32> to vector<8x16xbf16>
    %46 = vector.extract_strided_slice %10 {offsets = [0, 80], sizes = [8, 16], strides = [1, 1]} : vector<8x128xf32> to vector<8x16xf32>
    %47 = arith.truncf %46 : vector<8x16xf32> to vector<8x16xbf16>
    %48 = vector.extract_strided_slice %16 {offsets = [0, 16], sizes = [8, 16], strides = [1, 1]} : vector<8x64xf32> to vector<8x16xf32>
    %49 = arith.truncf %48 : vector<8x16xf32> to vector<8x16xbf16>
    %cst_23 = arith.constant dense<0.000000e+00> : vector<8x8xf32>
    %50 = tpu.matmul %45, %47, %cst_23 {dimension_numbers = #tpu.dot_dimension_numbers<[1], [1], [0], [0], [0, 0, 1, 0], [], []>} : vector<8x16xbf16>, vector<8x16xbf16>, vector<8x8xf32> -> vector<8x8xf32>
    %cst_24 = arith.constant 2.500000e-01 : f32
    %51 = vector.broadcast %cst_24 : f32 to vector<8x8xf32>
    %52 = arith.mulf %50, %51 : vector<8x8xf32>
    %cst_25 = arith.constant dense<0xFF800000> : vector<8xf32>
    %53 = vector.multi_reduction <maximumf>, %52, %cst_25 [1] : vector<8x8xf32> to vector<8xf32>
    %54 = vector.shape_cast %53 : vector<8xf32> to vector<8x1xf32>
    %55 = vector.broadcast %54 : vector<8x1xf32> to vector<8x8xf32>
    %56 = arith.subf %52, %55 : vector<8x8xf32>
    %57 = math.exp %56 : vector<8x8xf32>
    %cst_26 = arith.constant dense<0.000000e+00> : vector<8xf32>
    %58 = vector.multi_reduction <add>, %57, %cst_26 [1] : vector<8x8xf32> to vector<8xf32>
    %59 = vector.shape_cast %58 : vector<8xf32> to vector<8x1xf32>
    %60 = tpu.reciprocal %59 {approx = true} : vector<8x1xf32> -> vector<8x1xf32>
    %61 = vector.broadcast %60 : vector<8x1xf32> to vector<8x8xf32>
    %62 = arith.mulf %57, %61 : vector<8x8xf32>
    %63 = arith.truncf %62 : vector<8x8xf32> to vector<8x8xbf16>
    %cst_27 = arith.constant dense<0.000000e+00> : vector<8x16xf32>
    %64 = tpu.matmul %63, %49, %cst_27 {dimension_numbers = #tpu.dot_dimension_numbers<[1], [0], [0], [1], [0, 0, 1, 1], [], []>} : vector<8x8xbf16>, vector<8x16xbf16>, vector<8x16xf32> -> vector<8x16xf32>
    %65 = arith.truncf %64 : vector<8x16xf32> to vector<8x16xbf16>
    %66 = vector.extract_strided_slice %17 {offsets = [16, 0], sizes = [16, 64], strides = [1, 1]} : vector<64x64xbf16> to vector<16x64xbf16>
    %cst_28 = arith.constant dense<0.000000e+00> : vector<8x64xf32>
    %67 = tpu.matmul %65, %66, %cst_28 {dimension_numbers = #tpu.dot_dimension_numbers<[1], [0], [0], [1], [0, 0, 1, 1], [], []>} : vector<8x16xbf16>, vector<16x64xbf16>, vector<8x64xf32> -> vector<8x64xf32>
    %68 = arith.addf %43, %67 : vector<8x64xf32>
    %69 = vector.extract_strided_slice %10 {offsets = [0, 32], sizes = [8, 16], strides = [1, 1]} : vector<8x128xf32> to vector<8x16xf32>
    %70 = arith.truncf %69 : vector<8x16xf32> to vector<8x16xbf16>
    %71 = vector.extract_strided_slice %10 {offsets = [0, 96], sizes = [8, 16], strides = [1, 1]} : vector<8x128xf32> to vector<8x16xf32>
    %72 = arith.truncf %71 : vector<8x16xf32> to vector<8x16xbf16>
    %73 = vector.extract_strided_slice %16 {offsets = [0, 32], sizes = [8, 16], strides = [1, 1]} : vector<8x64xf32> to vector<8x16xf32>
    %74 = arith.truncf %73 : vector<8x16xf32> to vector<8x16xbf16>
    %cst_29 = arith.constant dense<0.000000e+00> : vector<8x8xf32>
    %75 = tpu.matmul %70, %72, %cst_29 {dimension_numbers = #tpu.dot_dimension_numbers<[1], [1], [0], [0], [0, 0, 1, 0], [], []>} : vector<8x16xbf16>, vector<8x16xbf16>, vector<8x8xf32> -> vector<8x8xf32>
    %cst_30 = arith.constant 2.500000e-01 : f32
    %76 = vector.broadcast %cst_30 : f32 to vector<8x8xf32>
    %77 = arith.mulf %75, %76 : vector<8x8xf32>
    %cst_31 = arith.constant dense<0xFF800000> : vector<8xf32>
    %78 = vector.multi_reduction <maximumf>, %77, %cst_31 [1] : vector<8x8xf32> to vector<8xf32>
    %79 = vector.shape_cast %78 : vector<8xf32> to vector<8x1xf32>
    %80 = vector.broadcast %79 : vector<8x1xf32> to vector<8x8xf32>
    %81 = arith.subf %77, %80 : vector<8x8xf32>
    %82 = math.exp %81 : vector<8x8xf32>
    %cst_32 = arith.constant dense<0.000000e+00> : vector<8xf32>
    %83 = vector.multi_reduction <add>, %82, %cst_32 [1] : vector<8x8xf32> to vector<8xf32>
    %84 = vector.shape_cast %83 : vector<8xf32> to vector<8x1xf32>
    %85 = tpu.reciprocal %84 {approx = true} : vector<8x1xf32> -> vector<8x1xf32>
    %86 = vector.broadcast %85 : vector<8x1xf32> to vector<8x8xf32>
    %87 = arith.mulf %82, %86 : vector<8x8xf32>
    %88 = arith.truncf %87 : vector<8x8xf32> to vector<8x8xbf16>
    %cst_33 = arith.constant dense<0.000000e+00> : vector<8x16xf32>
    %89 = tpu.matmul %88, %74, %cst_33 {dimension_numbers = #tpu.dot_dimension_numbers<[1], [0], [0], [1], [0, 0, 1, 1], [], []>} : vector<8x8xbf16>, vector<8x16xbf16>, vector<8x16xf32> -> vector<8x16xf32>
    %90 = arith.truncf %89 : vector<8x16xf32> to vector<8x16xbf16>
    %91 = vector.extract_strided_slice %17 {offsets = [32, 0], sizes = [16, 64], strides = [1, 1]} : vector<64x64xbf16> to vector<16x64xbf16>
    %cst_34 = arith.constant dense<0.000000e+00> : vector<8x64xf32>
    %92 = tpu.matmul %90, %91, %cst_34 {dimension_numbers = #tpu.dot_dimension_numbers<[1], [0], [0], [1], [0, 0, 1, 1], [], []>} : vector<8x16xbf16>, vector<16x64xbf16>, vector<8x64xf32> -> vector<8x64xf32>
    %93 = arith.addf %68, %92 : vector<8x64xf32>
    %94 = vector.extract_strided_slice %10 {offsets = [0, 48], sizes = [8, 16], strides = [1, 1]} : vector<8x128xf32> to vector<8x16xf32>
    %95 = arith.truncf %94 : vector<8x16xf32> to vector<8x16xbf16>
    %96 = vector.extract_strided_slice %10 {offsets = [0, 112], sizes = [8, 16], strides = [1, 1]} : vector<8x128xf32> to vector<8x16xf32>
    %97 = arith.truncf %96 : vector<8x16xf32> to vector<8x16xbf16>
    %98 = vector.extract_strided_slice %16 {offsets = [0, 48], sizes = [8, 16], strides = [1, 1]} : vector<8x64xf32> to vector<8x16xf32>
    %99 = arith.truncf %98 : vector<8x16xf32> to vector<8x16xbf16>
    %cst_35 = arith.constant dense<0.000000e+00> : vector<8x8xf32>
    %100 = tpu.matmul %95, %97, %cst_35 {dimension_numbers = #tpu.dot_dimension_numbers<[1], [1], [0], [0], [0, 0, 1, 0], [], []>} : vector<8x16xbf16>, vector<8x16xbf16>, vector<8x8xf32> -> vector<8x8xf32>
    %cst_36 = arith.constant 2.500000e-01 : f32
    %101 = vector.broadcast %cst_36 : f32 to vector<8x8xf32>
    %102 = arith.mulf %100, %101 : vector<8x8xf32>
    %cst_37 = arith.constant dense<0xFF800000> : vector<8xf32>
    %103 = vector.multi_reduction <maximumf>, %102, %cst_37 [1] : vector<8x8xf32> to vector<8xf32>
    %104 = vector.shape_cast %103 : vector<8xf32> to vector<8x1xf32>
    %105 = vector.broadcast %104 : vector<8x1xf32> to vector<8x8xf32>
    %106 = arith.subf %102, %105 : vector<8x8xf32>
    %107 = math.exp %106 : vector<8x8xf32>
    %cst_38 = arith.constant dense<0.000000e+00> : vector<8xf32>
    %108 = vector.multi_reduction <add>, %107, %cst_38 [1] : vector<8x8xf32> to vector<8xf32>
    %109 = vector.shape_cast %108 : vector<8xf32> to vector<8x1xf32>
    %110 = tpu.reciprocal %109 {approx = true} : vector<8x1xf32> -> vector<8x1xf32>
    %111 = vector.broadcast %110 : vector<8x1xf32> to vector<8x8xf32>
    %112 = arith.mulf %107, %111 : vector<8x8xf32>
    %113 = arith.truncf %112 : vector<8x8xf32> to vector<8x8xbf16>
    %cst_39 = arith.constant dense<0.000000e+00> : vector<8x16xf32>
    %114 = tpu.matmul %113, %99, %cst_39 {dimension_numbers = #tpu.dot_dimension_numbers<[1], [0], [0], [1], [0, 0, 1, 1], [], []>} : vector<8x8xbf16>, vector<8x16xbf16>, vector<8x16xf32> -> vector<8x16xf32>
    %115 = arith.truncf %114 : vector<8x16xf32> to vector<8x16xbf16>
    %116 = vector.extract_strided_slice %17 {offsets = [48, 0], sizes = [16, 64], strides = [1, 1]} : vector<64x64xbf16> to vector<16x64xbf16>
    %cst_40 = arith.constant dense<0.000000e+00> : vector<8x64xf32>
    %117 = tpu.matmul %115, %116, %cst_40 {dimension_numbers = #tpu.dot_dimension_numbers<[1], [0], [0], [1], [0, 0, 1, 1], [], []>} : vector<8x16xbf16>, vector<16x64xbf16>, vector<8x64xf32> -> vector<8x64xf32>
    %118 = arith.addf %93, %117 : vector<8x64xf32>
    %119 = arith.addf %1, %118 : vector<8x64xf32>
    %c0_41 = arith.constant 0 : index
    %c0_42 = arith.constant 0 : index
    %120 = vector.load %arg8[%c0_41, %c0_42] : memref<1x64xf32, #tpu.memory_space<vmem>>, vector<1x64xf32>
    %121 = vector.broadcast %120 : vector<1x64xf32> to vector<8x64xf32>
    %122 = arith.addf %119, %121 : vector<8x64xf32>
    %cst_43 = arith.constant dense<0.000000e+00> : vector<8xf32>
    %123 = vector.multi_reduction <add>, %122, %cst_43 [1] : vector<8x64xf32> to vector<8xf32>
    %124 = vector.shape_cast %123 : vector<8xf32> to vector<8x1xf32>
    %cst_44 = arith.constant 6.400000e+01 : f32
    %125 = vector.broadcast %cst_44 : f32 to vector<8x1xf32>
    %126 = arith.divf %124, %125 : vector<8x1xf32>
    %127 = vector.broadcast %126 : vector<8x1xf32> to vector<8x64xf32>
    %128 = arith.subf %122, %127 : vector<8x64xf32>
    %129 = arith.mulf %128, %128 : vector<8x64xf32>
    %cst_45 = arith.constant dense<0.000000e+00> : vector<8xf32>
    %130 = vector.multi_reduction <add>, %129, %cst_45 [1] : vector<8x64xf32> to vector<8xf32>
    %131 = vector.shape_cast %130 : vector<8xf32> to vector<8x1xf32>
    %cst_46 = arith.constant 6.400000e+01 : f32
    %132 = vector.broadcast %cst_46 : f32 to vector<8x1xf32>
    %133 = arith.divf %131, %132 : vector<8x1xf32>
    %cst_47 = arith.constant 9.99999974E-6 : f32
    %134 = vector.broadcast %cst_47 : f32 to vector<8x1xf32>
    %135 = arith.addf %133, %134 : vector<8x1xf32>
    %136 = math.rsqrt %135 : vector<8x1xf32>
    %137 = vector.broadcast %136 : vector<8x1xf32> to vector<8x64xf32>
    %138 = arith.mulf %128, %137 : vector<8x64xf32>
    %c0_48 = arith.constant 0 : index
    %c0_49 = arith.constant 0 : index
    %139 = vector.load %arg9[%c0_48, %c0_49] : memref<1x64xf32, #tpu.memory_space<vmem>>, vector<1x64xf32>
    %140 = vector.broadcast %139 : vector<1x64xf32> to vector<8x64xf32>
    %141 = arith.mulf %138, %140 : vector<8x64xf32>
    %c0_50 = arith.constant 0 : index
    %c0_51 = arith.constant 0 : index
    %142 = vector.load %arg10[%c0_50, %c0_51] : memref<1x64xf32, #tpu.memory_space<vmem>>, vector<1x64xf32>
    %143 = vector.broadcast %142 : vector<1x64xf32> to vector<8x64xf32>
    %144 = arith.addf %141, %143 : vector<8x64xf32>
    %c0_52 = arith.constant 0 : index
    %c0_53 = arith.constant 0 : index
    %c0_54 = arith.constant 0 : index
    %145 = vector.load %arg13[%c0_52, %c0_53, %c0_54] : memref<1x8x64xf32, #tpu.memory_space<vmem>>, vector<1x8x64xf32>
    %146 = vector.shape_cast %145 : vector<1x8x64xf32> to vector<8x64xf32>
    %147 = vector.shape_cast %144 : vector<8x64xf32> to vector<1x8x64xf32>
    tpu.vector_store %arg13[%c0_52, %c0_53, %c0_54], %147 {strides = array<i32>} : memref<1x8x64xf32, #tpu.memory_space<vmem>>, vector<1x8x64xf32>,
    %148 = arith.addf %144, %3 : vector<8x64xf32>
    %c0_55 = arith.constant 0 : index
    %c0_56 = arith.constant 0 : index
    %149 = vector.load %arg11[%c0_55, %c0_56] : memref<64x128xf32, #tpu.memory_space<vmem>>, vector<64x128xf32>
    %cst_57 = arith.constant dense<0.000000e+00> : vector<8x128xf32>
    %150 = tpu.matmul %148, %149, %cst_57 {dimension_numbers = #tpu.dot_dimension_numbers<[1], [0], [0], [1], [0, 0, 1, 1], [], []>} : vector<8x64xf32>, vector<64x128xf32>, vector<8x128xf32> -> vector<8x128xf32>
    %c0_58 = arith.constant 0 : index
    %c0_59 = arith.constant 0 : index
    %151 = vector.load %arg12[%c0_58, %c0_59] : memref<1x128xf32, #tpu.memory_space<vmem>>, vector<1x128xf32>
    %152 = vector.broadcast %151 : vector<1x128xf32> to vector<8x128xf32>
    %153 = arith.addf %150, %152 : vector<8x128xf32>
    %c0_60 = arith.constant 0 : index
    %c0_61 = arith.constant 0 : index
    %c0_62 = arith.constant 0 : index
    %154 = vector.load %arg14[%c0_60, %c0_61, %c0_62] : memref<1x8x128xf32, #tpu.memory_space<vmem>>, vector<1x8x128xf32>
    %155 = vector.shape_cast %154 : vector<1x8x128xf32> to vector<8x128xf32>
    %156 = vector.shape_cast %153 : vector<8x128xf32> to vector<1x8x128xf32>
    tpu.vector_store %arg14[%c0_60, %c0_61, %c0_62], %156 {strides = array<i32>} : memref<1x8x128xf32, #tpu.memory_space<vmem>>, vector<1x8x128xf32>,
    return
  }
  func.func @transform_0(%arg0: i32) -> (i32, i32, i32) {
    %c0_i32 = arith.constant 0 : i32
    %c0_i32_0 = arith.constant 0 : i32
    %c0_i32_1 = arith.constant 0 : i32
    return %arg0, %c0_i32, %c0_i32_0 : i32, i32, i32
  }
  func.func @transform_1(%arg0: i32) -> (i32, i32, i32) {
    %c0_i32 = arith.constant 0 : i32
    %c0_i32_0 = arith.constant 0 : i32
    %c0_i32_1 = arith.constant 0 : i32
    return %arg0, %c0_i32, %c0_i32_0 : i32, i32, i32
  }
  func.func @transform_2(%arg0: i32) -> (i32, i32) {
    %c0_i32 = arith.constant 0 : i32
    %c0_i32_0 = arith.constant 0 : i32
    %c0_i32_1 = arith.constant 0 : i32
    return %c0_i32, %c0_i32_0 : i32, i32
  }
  func.func @transform_3(%arg0: i32) -> (i32, i32) {
    %c0_i32 = arith.constant 0 : i32
    %c0_i32_0 = arith.constant 0 : i32
    %c0_i32_1 = arith.constant 0 : i32
    return %c0_i32, %c0_i32_0 : i32, i32
  }
  func.func @transform_4(%arg0: i32) -> (i32, i32) {
    %c0_i32 = arith.constant 0 : i32
    %c0_i32_0 = arith.constant 0 : i32
    %c0_i32_1 = arith.constant 0 : i32
    return %c0_i32, %c0_i32_0 : i32, i32
  }
  func.func @transform_5(%arg0: i32) -> (i32, i32) {
    %c0_i32 = arith.constant 0 : i32
    %c0_i32_0 = arith.constant 0 : i32
    %c0_i32_1 = arith.constant 0 : i32
    return %c0_i32, %c0_i32_0 : i32, i32
  }
  func.func @transform_6(%arg0: i32) -> (i32, i32) {
    %c0_i32 = arith.constant 0 : i32
    %c0_i32_0 = arith.constant 0 : i32
    %c0_i32_1 = arith.constant 0 : i32
    return %c0_i32, %c0_i32_0 : i32, i32
  }
  func.func @transform_7(%arg0: i32) -> (i32, i32) {
    %c0_i32 = arith.constant 0 : i32
    %c0_i32_0 = arith.constant 0 : i32
    %c0_i32_1 = arith.constant 0 : i32
    return %c0_i32, %c0_i32_0 : i32, i32
  }
  func.func @transform_8(%arg0: i32) -> (i32, i32) {
    %c0_i32 = arith.constant 0 : i32
    %c0_i32_0 = arith.constant 0 : i32
    %c0_i32_1 = arith.constant 0 : i32
    return %c0_i32, %c0_i32_0 : i32, i32
  }
  func.func @transform_9(%arg0: i32) -> (i32, i32) {
    %c0_i32 = arith.constant 0 : i32
    %c0_i32_0 = arith.constant 0 : i32
    %c0_i32_1 = arith.constant 0 : i32
    return %c0_i32, %c0_i32_0 : i32, i32
  }
  func.func @transform_10(%arg0: i32) -> (i32, i32) {
    %c0_i32 = arith.constant 0 : i32
    %c0_i32_0 = arith.constant 0 : i32
    %c0_i32_1 = arith.constant 0 : i32
    return %c0_i32, %c0_i32_0 : i32, i32
  }
  func.func @transform_11(%arg0: i32) -> (i32, i32) {
    %c0_i32 = arith.constant 0 : i32
    %c0_i32_0 = arith.constant 0 : i32
    %c0_i32_1 = arith.constant 0 : i32
    return %c0_i32, %c0_i32_0 : i32, i32
  }
  func.func @transform_12(%arg0: i32) -> (i32, i32, i32) {
    %c0_i32 = arith.constant 0 : i32
    %c0_i32_0 = arith.constant 0 : i32
    %c0_i32_1 = arith.constant 0 : i32
    return %arg0, %c0_i32, %c0_i32_0 : i32, i32, i32
  }
  func.func @transform_13(%arg0: i32) -> (i32, i32, i32) {
    %c0_i32 = arith.constant 0 : i32
    %c0_i32_0 = arith.constant 0 : i32
    %c0_i32_1 = arith.constant 0 : i32
    return %arg0, %c0_i32, %c0_i32_0 : i32, i32, i32
  }
}

</mosaic_0001>

<bundles_post_ra>
// kernel: tpu_custom_call.1
= control target key start
LH: loop header
LB: loop body
LE: loop exit
PB: predicated region body
PF: predicated region fallthrough
CT: control target
= control target key end

     0   :  { %s2964_s0 = inlined_call_operand.hbm [shape: f32[2,8,64], index: 0, kind: input, shape index: {}]   ;;  %s2965_s1 = inlined_call_operand.hbm [shape: f32[2,8,64], index: 1, kind: input, shape index: {}]   ;;  %s2966_s2 = inlined_call_operand.hbm [shape: bf16[64,128], index: 2, kind: input, shape index: {}]   ;;  %s2967_s3 = inlined_call_operand.vmem [shape: f32[1,128], index: 3, kind: input, shape index: {}]   ;;  %s2968_s4 = inlined_call_operand.hbm [shape: bf16[64,64], index: 4, kind: input, shape index: {}]   ;;  %s2969_s5 = inlined_call_operand.vmem [shape: f32[1,64], index: 5, kind: input, shape index: {}]   ;;  %s2970_s6 = inlined_call_operand.hbm [shape: bf16[64,64], index: 6, kind: input, shape index: {}]   ;;  %s2971_s7 = inlined_call_operand.vmem [shape: f32[1,64], index: 7, kind: input, shape index: {}]   ;;  %s2972_s8 = inlined_call_operand.vmem [shape: f32[1,64], index: 8, kind: input, shape index: {}]   ;;  %s2973_s9 = inlined_call_operand.vmem [shape: f32[1,64], index: 9, kind: input, shape index: {}]   ;;  %s2974_s10 = inlined_call_operand.hbm [shape: f32[64,128], index: 10, kind: input, shape index: {}]   ;;  %s2975_s11 = inlined_call_operand.vmem [shape: f32[1,128], index: 11, kind: input, shape index: {}]   ;;  %s2976_s12 = inlined_call_operand.hbm [shape: f32[2,8,64], index: 12, kind: output, shape index: {0}]   ;;  %s2977_s13 = inlined_call_operand.hbm [shape: f32[2,8,128], index: 13, kind: output, shape index: {1}]  }
   0x1   :  { %2984 = sst [smem:[#allocation24_spill]] %s2966_s2 }
   0x2   :  { %2985 = sst [smem:[#allocation25_spill]] %s2968_s4 }
   0x3   :  { %2986 = sst [smem:[#allocation26_spill]] %s2970_s6 }
   0x4   :  { %2987 = sst [smem:[#allocation27_spill]] %s2972_s8 }
   0x5   :  { %2988 = sst [smem:[#allocation28_spill]] %s2973_s9 }
   0x6   :  { %2989 = sst [smem:[#allocation29_spill]] %s2974_s10 }
   0x7   :  { %2990 = sst [smem:[#allocation30_spill]] %s2975_s11 }
   0x8   :  { %2991 = sst [smem:[#allocation31_spill]] %s2976_s12 }
   0x9   :  { %2992 = sst [smem:[#allocation32_spill]] %s2977_s13 }
   0xa   :  { %19 = vsyncpa [#allocation3], 0 }
   0xb   :  { %21 = vsyncpa [#allocation3 + $0x1], 0 }
   0xc   :  { %22 = vsyncpa [#allocation6], 0 }
   0xd   :  { %24 = vsyncpa [#allocation6 + $0x1], 0 }
   0xe   :  { %25 = vsyncpa [#allocation9], 0 }
   0xf   :  { %26 = vsyncpa [#allocation12], 0 }
  0x10   :  { %27 = vsyncpa [#allocation4], 0 }
  0x11   :  { %29 = vsyncpa [#allocation4 + $0x1], 0 }
  0x12   :  { %30 = vsyncpa [#allocation15], 0 }
  0x13   :  { %32 = vsyncpa [#allocation15 + $0x1], 0  ;;  %s2465_s25 = smov 0   ;;  %s2467_s26 = smov 0  }
  0x14   :  { %s2469_s27 = smov 0   ;;  %s2471_s28 = smov 0  }
  0x15 LB: > { %s2373_s29 = smov [#allocation7]   ;;  %s2486_s14 = sadd.s32 4294967295, %s2371_s28   ;;  %s2371_s28 = sphi %s2471_s28, %s3027_s28   ;;  %s2367_s27 = sphi %s2469_s27, %s3026_s27   ;;  %s2363_s26 = sphi %s2467_s26, %s3025_s26   ;;  %s2359_s25 = sphi %s2465_s25, %s3024_s25  }
  0x16   : > { %s369_s30 = sshll.u32 %s2373_s29, 4  ;;  %p1716_p0 = scmp.ge.s32.totalorder %s2371_s28, 1  ;;  %s2491_s30 = int_to_ptr.vmem [resolvable:$true] %s369_s30 }
  0x17   : > { %p2980_p1 = scmp.eq.s32.totalorder %s2486_s14, 0  ;;  %p357_p2 = scmp.lt.s32.totalorder %s2371_s28, 3 }
  0x18   : > { %s2374_s16 = smov [#allocation8]   ;;  %s2375_s19 = smov [#allocation10]  }
  0x19   : > { %p2493_p3 = pnand %p1716_p0, %p357_p2  ;;  %s385_s17 = sshll.u32 %s2374_s16, 4  ;;  %s2506_s17 = int_to_ptr.vmem [resolvable:$true] %s385_s17 }
  0x1a   : > { %s401_s20 = sshll.u32 %s2375_s19, 4  ;;  %s2995_s2 = sld [smem:[#allocation24_spill]]  ;;  %s2508_s20 = int_to_ptr.vmem [resolvable:$true] %s401_s20 }
  0x1b   : > { %s2993_s15 = scalar_select %p2493_p3, 1, 0 }
  0x1c   : > { %p1968_p5 = pneg %p2493_p3 }
  0x1e   : > { %p2502_p6 = pnand %p1968_p5, %p2980_p1 }
  0x20   : > { %s2085_s23 = scalar_lea.hbm %s2995_s2, 512  ;;  %p2518_p8 = pneg %p2502_p6 }
  0x21   : > { %p2086_p7 = scmp.ne.s32.totalorder %s2995_s2, %s2085_s23  ;;  %p2092_p11 = scmp.lt.u32.totalorder %s2085_s23, %s2995_s2 }
  0x23   : > { %p2088_p9 = pnand %p2518_p8, %p2086_p7 }
  0x25   : > { %p2089_p10 = pneg %p2088_p9 }
  0x27   : > { %p2094_p12 = pnand %p2092_p11, %p2089_p10 }
  0x29   : > { %2097 = shalt.err (!%p2094_p12)
}
  0x2a   : > { %s2098_s21 = scalar_lea.vmem %s2491_s30, 512  ;;  %p2106_p5 = scmp.lt.s32.totalorder %s2491_s30, %s2491_s30 }
  0x2b   : > { %p2099_p13 = scmp.ne.s32.totalorder %s2491_s30, %s2098_s21  ;;  %p2107_p4 = scmp.lt.s32.totalorder %s2098_s21, %s2098_s21 }
  0x2d   : > { %p2101_p0 = pnand %p2099_p13, %p2518_p8  ;;  %p2108_p7 = por %p2107_p4, %p2106_p5 }
  0x2f   : > { %p2102_p2 = pneg %p2101_p0 }
  0x31   : > { %p2109_p9 = pnand %p2108_p7, %p2102_p2 }
  0x33   : > { %2112 = shalt.err (!%p2109_p9)
}
  0x34   : > { %s2376_s22 = smov 64   ;;  %s2377_s13 = smov 4  }
  0x35   : > { %1971 = dma.hbm_to_vmem [thread:$0]  (!%p2502_p6), %s2995_s2, 512, %s2491_s30, [#allocation6], %s2376_s22, %s2376_s22, %s2377_s13  }
  0x36   : > { %s2997_s4 = sld [smem:[#allocation25_spill]] }
  0x3c   : > { %s2113_s21 = scalar_lea.hbm %s2997_s4, 512 }
  0x3d   : > { %p2114_p4 = scmp.ne.s32.totalorder %s2997_s4, %s2113_s21  ;;  %p2120_p12 = scmp.lt.u32.totalorder %s2113_s21, %s2997_s4 }
  0x3f   : > { %p2116_p10 = pnand %p2114_p4, %p2518_p8 }
  0x41   : > { %p2117_p11 = pneg %p2116_p10 }
  0x43   : > { %p2122_p13 = pnand %p2120_p12, %p2117_p11 }
  0x45   : > { %2125 = shalt.err (!%p2122_p13)
}
  0x46   : > { %s2126_s30 = scalar_lea.vmem %s2506_s17, 512  ;;  %p2134_p7 = scmp.lt.s32.totalorder %s2506_s17, %s2506_s17 }
  0x47   : > { %p2127_p0 = scmp.ne.s32.totalorder %s2506_s17, %s2126_s30  ;;  %p2135_p9 = scmp.lt.s32.totalorder %s2126_s30, %s2126_s30 }
  0x49   : > { %p2129_p2 = pnand %p2127_p0, %p2518_p8  ;;  %p2136_p4 = por %p2135_p9, %p2134_p7 }
  0x4b   : > { %p2130_p5 = pneg %p2129_p2 }
  0x4d   : > { %p2137_p10 = pnand %p2136_p4, %p2130_p5 }
  0x4f   : > { %2140 = shalt.err (!%p2137_p10)
}
  0x50   : > { %1974 = dma.hbm_to_vmem [thread:$0]  (!%p2502_p6), %s2997_s4, 512, %s2506_s17, [#allocation9], %s2376_s22, %s2376_s22, %s2377_s13  }
  0x51   : > { %s2998_s6 = sld [smem:[#allocation26_spill]] }
  0x57   : > { %s2141_s23 = scalar_lea.hbm %s2998_s6, 512 }
  0x58   : > { %p2142_p11 = scmp.ne.s32.totalorder %s2998_s6, %s2141_s23  ;;  %p2148_p0 = scmp.lt.u32.totalorder %s2141_s23, %s2998_s6 }
  0x5a   : > { %p2144_p12 = pnand %p2142_p11, %p2518_p8 }
  0x5c   : > { %p2145_p13 = pneg %p2144_p12 }
  0x5e   : > { %p2150_p2 = pnand %p2148_p0, %p2145_p13 }
  0x60   : > { %2153 = shalt.err (!%p2150_p2)
}
  0x61   : > { %s2154_s17 = scalar_lea.vmem %s2508_s20, 512  ;;  %p2162_p4 = scmp.lt.s32.totalorder %s2508_s20, %s2508_s20 }
  0x62   : > { %p2155_p5 = scmp.ne.s32.totalorder %s2508_s20, %s2154_s17  ;;  %p2163_p10 = scmp.lt.s32.totalorder %s2154_s17, %s2154_s17 }
  0x64   : > { %p2157_p7 = pnand %p2155_p5, %p2518_p8  ;;  %p2164_p11 = por %p2163_p10, %p2162_p4 }
  0x66   : > { %p2158_p9 = pneg %p2157_p7 }
  0x68   : > { %p2165_p12 = pnand %p2164_p11, %p2158_p9 }
  0x6a   : > { %2168 = shalt.err (!%p2165_p12)
}
  0x6b   : > { %1977 = dma.hbm_to_vmem [thread:$0]  (!%p2502_p6), %s2998_s6, 512, %s2508_s20, [#allocation9], %s2376_s22, %s2376_s22, %s2377_s13  }
  0x6c   : > { %s2378_s9 = smov [#allocation11]   ;;  %s2999_s10 = sld [smem:[#allocation29_spill]] }
  0x6d   : > { %s423_s11 = sshll.u32 %s2378_s9, 4  ;;  %s424_s11 = int_to_ptr.vmem [resolvable:$true] %s423_s11 }
  0x72   : > { %s2169_s24 = scalar_lea.hbm %s2999_s10, 1024 }
  0x73   : > { %p2170_p13 = scmp.ne.s32.totalorder %s2999_s10, %s2169_s24  ;;  %p2176_p5 = scmp.lt.u32.totalorder %s2169_s24, %s2999_s10 }
  0x75   : > { %p2172_p0 = pnand %p2170_p13, %p2518_p8 }
  0x77   : > { %p2173_p2 = pneg %p2172_p0 }
  0x79   : > { %p2178_p7 = pnand %p2176_p5, %p2173_p2 }
  0x7b   : > { %2181 = shalt.err (!%p2178_p7)
}
  0x7c   : > { %s2182_s20 = scalar_lea.vmem %s424_s11, 1024  ;;  %p2190_p11 = scmp.lt.s32.totalorder %s424_s11, %s424_s11 }
  0x7d   : > { %p2183_p9 = scmp.ne.s32.totalorder %s424_s11, %s2182_s20  ;;  %p2191_p12 = scmp.lt.s32.totalorder %s2182_s20, %s2182_s20 }
  0x7f   : > { %p2185_p4 = pnand %p2183_p9, %p2518_p8  ;;  %p2192_p1 = por %p2191_p12, %p2190_p11 }
  0x81   : > { %p2186_p10 = pneg %p2185_p4 }
  0x83   : > { %p2193_p3 = pnand %p2192_p1, %p2186_p10 }
  0x85   : > { %2196 = shalt.err (!%p2193_p3)
}
  0x86   : > { %s2379_s22 = smov 128   ;;  %s2380_s16 = smov 8  }
  0x87   : > { %1980 = dma.hbm_to_vmem [thread:$0]  (!%p2502_p6), %s2999_s10, 1024, %s424_s11, [#allocation12], %s2379_s22, %s2379_s22, %s2380_s16  }
  0x88   : > { %s1715_s8 = sadd.s32 4294967294, %s2371_s28   ;;  %s2614_s9 = sadd.s32 1, %s2371_s28  }
  0x89   : > { %s42_s12 = ssub.s32 %s2371_s28, %s2614_s9  ;;  %s45_s23 = sadd.s32 1, %s2367_s27 }
  0x8a   : > { %p43_p1 = scmp.eq.s32.totalorder %s42_s12, 0  ;;  %p52_p3 = scmp.ne.s32.totalorder %s2367_s27, %s2363_s26 }
  0x8b   : > { %p53_p8 = scmp.eq.s32.totalorder %s2371_s28, 0  ;;  %p58_p13 = scmp.ne.s32.totalorder %s2363_s26, %s2359_s25 }
  0x8c   : > { %s2625_s24 = scalar_select %p43_p1, %s2367_s27, %s45_s23  }
  0x8d   : > { %p2627_p0 = por %p53_p8, %p52_p3  ;;  %p3002_p2 = scmp.eq.s32.totalorder %s2486_s14, 0 }
  0x8e   : > { %3000 = sst [smem:[#allocation23_spill]] %s2625_s24  ;;  %p318_p5 = scmp.eq.s32.totalorder %s2486_s14, 1 }
  0x8f   : > { %p2633_p6 = por %p3002_p2, %p58_p13  ;;  %p324_p7 = scmp.eq.s32.totalorder %s1715_s8, 1 }
  0x90   : > { %p1999_p9 = scmp.lt.s32.totalorder %s2371_s28, 2  ;;  %s440_s29 = sand.u32 1, %s2367_s27  }
  0x91   : > { %s3003_s11 = scalar_select %p2633_p6, 1, 0 }
  0x92   : > { %p2640_p4 = por %p318_p5, %p52_p3  ;;  %p2644_p10 = por %p324_p7, %p58_p13 }
  0x93   : > { %s2648_s17 = sshll.u32 %s440_s29, 3  ;;  %s1723_s20 = sshll.u32 %s2371_s28, 7 }
  0x94   : > { %s3004_s19 = scalar_select %p2640_p4, 1, 0 }
  0x95   : > { %s3005_s21 = scalar_select %p2644_p10, 1, 0 }
  0x96   : > { %s2654_s13 = scalar_lea.hbm %s2964_s0, %s1723_s20  ;;  %s444_s30 = scalar_lea.vmem [#allocation2], %s2648_s17 }
  0x97   : > { %s451_s8 = sshll.u32 %s444_s30, 4  ;;  %p2661_p11 = pnand %p1999_p9, %p2627_p0  ;;  %s2657_s8 = int_to_ptr.vmem [resolvable:$true] %s451_s8 }
  0x98   : > { %s2668_s22 = scalar_lea.hbm %s2965_s1, %s1723_s20  ;;  %s458_s16 = sand.u32 1, %s2371_s28  }
  0x99   : > { %s441_s4 = scalar_lea.sflag [#allocation3], %s440_s29  ;;  %s2197_s6 = scalar_lea.hbm %s2654_s13, 128 }
  0x9a   : > { %p2198_p12 = scmp.ne.s32.totalorder %s2654_s13, %s2197_s6  ;;  %p2199_p1 = pneg %p2661_p11 }
  0x9b   : > { %s2202_s10 = scalar_lea.hbm %s2964_s0, 256  ;;  %p2203_p13 = scmp.lt.u32.totalorder %s2654_s13, %s2964_s0 }
  0x9c   : > { %p2200_p3 = pnand %p2199_p1, %p2198_p12  ;;  %p2204_p0 = scmp.lt.u32.totalorder %s2202_s10, %s2197_s6 }
  0x9d   : > { %p2206_p5 = scmp.lt.u32.totalorder %s2197_s6, %s2654_s13 }
  0x9e   : > { %p2201_p8 = pneg %p2200_p3  ;;  %p2205_p2 = por %p2204_p0, %p2203_p13 }
  0xa0   : > { %p2207_p7 = por %p2206_p5, %p2205_p2 }
  0xa2   : > { %p2208_p9 = pnand %p2207_p7, %p2201_p8 }
  0xa4   : > { %2211 = shalt.err (!%p2208_p9)
}
  0xa5   : > { %s2212_s29 = scalar_lea.vmem %s2657_s8, 128  ;;  %s2381_s20 = smov [#allocation2]  }
  0xa6   : > { %p2213_p12 = scmp.ne.s32.totalorder %s2657_s8, %s2212_s29  ;;  %s2217_s23 = sshll.u32 %s2381_s20, 4  ;;  %s2218_s23 = int_to_ptr.vmem [resolvable:$false] %s2217_s23 }
  0xa7   : > { %s2219_s24 = scalar_lea.vmem %s2218_s23, 256  ;;  %p2220_p4 = scmp.lt.s32.totalorder %s2657_s8, %s2218_s23 }
  0xa8   : > { %p2215_p3 = pnand %p2213_p12, %p2199_p1  ;;  %p2221_p13 = scmp.lt.s32.totalorder %s2219_s24, %s2212_s29 }
  0xaa   : > { %p2216_p10 = pneg %p2215_p3  ;;  %p2222_p0 = por %p2221_p13, %p2220_p4 }
  0xac   : > { %p2223_p2 = pnand %p2222_p0, %p2216_p10 }
  0xae   : > { %2226 = shalt.err (!%p2223_p2)
}
  0xaf   : > { %1984 = dma.hbm_to_vmem [thread:$0]  (!%p2661_p11), %s2654_s13, 128, %s2657_s8, %s441_s4  }
  0xb0   : > { %s462_s6 = scalar_lea.vmem [#allocation5], %s2648_s17  ;;  %s459_s18 = scalar_lea.sflag [#allocation6], %s458_s16 }
  0xb1   : > { %s469_s10 = sshll.u32 %s462_s6, 4  ;;  %s2227_s30 = scalar_lea.hbm %s2668_s22, 128  ;;  %s470_s10 = int_to_ptr.vmem [resolvable:$true] %s469_s10 }
  0xb2   : > { %p2228_p4 = scmp.ne.s32.totalorder %s2668_s22, %s2227_s30  ;;  %s2232_s20 = scalar_lea.hbm %s2965_s1, 256 }
  0xb3   : > { %p2233_p5 = scmp.lt.u32.totalorder %s2668_s22, %s2965_s1  ;;  %p2234_p7 = scmp.lt.u32.totalorder %s2232_s20, %s2227_s30 }
  0xb4   : > { %p2230_p10 = pnand %p2228_p4, %p2199_p1  ;;  %p2236_p12 = scmp.lt.u32.totalorder %s2227_s30, %s2668_s22 }
  0xb5   : > { %p2235_p9 = por %p2234_p7, %p2233_p5 }
  0xb6   : > { %p2231_p8 = pneg %p2230_p10 }
  0xb7   : > { %p2237_p3 = por %p2236_p12, %p2235_p9 }
  0xb9   : > { %p2238_p13 = pnand %p2237_p3, %p2231_p8 }
  0xbb   : > { %2241 = shalt.err (!%p2238_p13)
}
  0xbc   : > { %s2242_s4 = scalar_lea.vmem %s470_s10, 128  ;;  %s2382_s17 = smov [#allocation5]  }
  0xbd   : > { %p2243_p0 = scmp.ne.s32.totalorder %s470_s10, %s2242_s4  ;;  %s2247_s13 = sshll.u32 %s2382_s17, 4  ;;  %s2248_s13 = int_to_ptr.vmem [resolvable:$false] %s2247_s13 }
  0xbe   : > { %s2249_s8 = scalar_lea.vmem %s2248_s13, 256  ;;  %p2250_p10 = scmp.lt.s32.totalorder %s470_s10, %s2248_s13 }
  0xbf   : > { %p2245_p2 = pnand %p2243_p0, %p2199_p1  ;;  %p2251_p6 = scmp.lt.s32.totalorder %s2249_s8, %s2242_s4 }
  0xc1   : > { %p2246_p4 = pneg %p2245_p2  ;;  %p2252_p5 = por %p2251_p6, %p2250_p10 }
  0xc3   : > { %p2253_p7 = pnand %p2252_p5, %p2246_p4 }
  0xc5   : > { %2256 = shalt.err (!%p2253_p7)
}
  0xc6   : > { %1987 = dma.hbm_to_vmem [thread:$0]  (!%p2661_p11), %s2668_s22, 128, %s470_s10, %s459_s18  }
  0xc7   : > { %p3007_p8 = scmp.ne.s32.totalorder %s2993_s15, 0 }
  0xc8   : > { %s2721_s16 = sand.u32 (!%p3007_p8), 1, %s2363_s26   ;;  %p3008_p6 = scmp.ne.s32.totalorder (!%p3007_p8), %s3003_s11, 0 }
  0xc9   : > { %478 = sbr.rel (%p3007_p8) target bundleno = 3382 (0xd36), region = 68  ;;  %s2724_s6 = sshll.u32 (!%p3007_p8), %s2721_s16, 3 }
  0xca   : > { %s481_s30 = scalar_lea.sflag (!%p3007_p8), [#allocation3], %s2721_s16  ;;  %s484_s2 = scalar_lea.vmem (!%p3007_p8), [#allocation2], %s2724_s6 }
  0xd0   : > { %2330 = dma.done.wait (%p3008_p6), %s481_s30, 128  }
  0xd1   : > { %2332 = vsyncadd (%p3008_p6), %s481_s30, 4294967168  ;;  %s489_s15 = sand.u32 1, %s2486_s14   ;;  %s493_s22 = scalar_lea.vmem [#allocation5], %s2724_s6 }
  0xd2   : > { %s490_s12 = scalar_lea.sflag [#allocation6], %s489_s15 }
  0xd3   : > { %2334 = dma.done.wait (%p3008_p6), %s490_s12, 128  }
  0xd4   : > { %2336 = vsyncadd (%p3008_p6), %s490_s12, 4294967168  ;;  %p3009_p11 = scmp.eq.s32.totalorder %s2486_s14, 0 }
  0xd6   : > { %2338 = dma.done.wait (%p3009_p11), [#allocation6], 512   ;;  %p3010_p1 = pmov %p3009_p11 }
  0xd8   : > { %2340 = vsyncadd (%p3010_p1), [#allocation6], 4294966784  ;;  %p3011_p9 = pmov %p3010_p1 }
  0xd9   : > { %p3012_p12 = pmov %p3010_p1 }
  0xda   : > { %2342 = dma.done.wait (%p3011_p9), [#allocation9], 1024  }
  0xdb   : > { %2344 = vsyncadd (%p3012_p12), [#allocation9], 4294966272  ;;  %p3013_p3 = pmov %p3010_p1 }
  0xdc   : > { %p3014_p13 = pmov %p3010_p1 }
  0xdd   : > { %2346 = dma.done.wait (%p3013_p3), [#allocation12], 1024  }
  0xde   : > { %2348 = vsyncadd (%p3014_p13), [#allocation12], 4294966272  ;;  %v2383_v0 = vmov 0.0   ;;  %vm2384_vm0 = vmmov 0   ;;  %v2055_v1 = vld [vmem:[#allocation7] sm:$0xff]   ;;  %v2056_v2 = vld [vmem:[#allocation7 + $0x8] sm:$0xff]  }
  0xdf   : > { %1817 = vmatprep.subr.bf16.mxu0 %v2383_v0  ;;  %1825 = vmatprep.mubr.msk.bf16.mxu0 %vm2384_vm0, %v2383_v0  ;;  %v2057_v3 = vld [vmem:[#allocation7 + $0x10] sm:$0xff]   ;;  %v2757_v4 = vld [vmem:[%s484_s2] sm:$0xff]  ;;  %v2058_v7 = vld [vmem:[#allocation7 + $0x18] sm:$0xff]   ;;  %vm606_vm1 = vcmask 523264   ;;  %s2385_s18 = smov 112   ;;  %s2386_s29 = smov 64  }
  0xe0   : > { %1829 = vmatprep.subr.bf16.mxu1 %v2383_v0  ;;  %1837 = vmatprep.mubr.msk.bf16.mxu1 %vm2384_vm0, %v2383_v0  ;;  %v2759_v5 = vld [vmem:[%s493_s22] sm:$0xff]  ;;  %v2059_v9 = vld [vmem:[#allocation8] sm:$0xff]   ;;  %v2060_v10 = vld [vmem:[#allocation8 + $0x8] sm:$0xff]   ;;  %v650_v13 = vpack.c.bf16 %v2757_v4, %v2757_v4  ;;  %s2387_s20 = smov 48   ;;  %vm746_vm2 = vcmask 130048   ;;  %vm810_vm3 = vcmask 1043456  }
  0xe1   : > { %1818 = vmatpush3.bf16.msra.mxu0 %v2055_v1  ;;  %v565_v6 = vadd.f32 %v2759_v5, %v2757_v4  ;;  %1830 = vmatpush3.bf16.msra.mxu1 %v2059_v9  ;;  %v2061_v11 = vld [vmem:[#allocation8 + $0x10] sm:$0xff]   ;;  %v2062_v12 = vld [vmem:[#allocation8 + $0x18] sm:$0xff]   ;;  %v1735_v14 = vld [vmem:[%s2967_s3] ss:$0 sm:$0xff]  ;;  %vm794_vm4 = vcmask 64512   ;;  %s2388_s4 = smov 32  }
  0xe2   : > { %1819 = vmatprep.subr.bf16.mxu0 %v2383_v0  ;;  %1831 = vmatprep.subr.bf16.mxu1 %v2383_v0  ;;  %v1741_v25 = vld [vmem:[%s2969_s5] ss:$0 sm:$0xff]  ;;  %s2389_s17 = smov 96   ;;  %s2390_s13 = smov 80  }
  0xe3   : > { %v566_v8 = vpack.c.bf16 %v565_v6, %v565_v6  ;;  %v2064_v6 = vld [vmem:[#allocation10 + $0x8] sm:$0xff]   ;;  %s2391_s8 = smov 16   ;;  %s3015_s22 = sld [smem:[#allocation27_spill]] }
  0xe4   : > { %p3018_p2 = scmp.ne.s32.totalorder %s3004_s19, 0  ;;  %s2393_s2 = smov [#allocation13]  }
  0xe5   : > { %1820 = vmatpush3.bf16.msra.mxu0 %v2056_v2  ;;  %1832 = vmatpush3.bf16.msra.mxu1 %v2060_v10  ;;  %s2261_s15 = sshll.u32 %s2393_s2, 4  ;;  %s2262_s15 = int_to_ptr.vmem [resolvable:$false] %s2261_s15 }
  0xe6   : > { %1821 = vmatprep.subr.bf16.mxu0 %v2383_v0  ;;  %1833 = vmatprep.subr.bf16.mxu1 %v2383_v0  ;;  %s2263_s12 = scalar_lea.vmem %s2262_s15, 256 }
  0xe9   : > { %1822 = vmatpush3.bf16.msra.mxu0 %v2057_v3  ;;  %1834 = vmatpush3.bf16.msra.mxu1 %v2061_v11  ;;  %v2063_v3 = vld [vmem:[#allocation10] sm:$0xff]  }
  0xea   : > { %1823 = vmatprep.subr.bf16.mxu0 %v2383_v0  ;;  %1835 = vmatprep.subr.bf16.mxu1 %v2383_v0 }
  0xed   : > { %1824 = vmatpush3.bf16.msra.mxu0 %v2058_v7  ;;  %1836 = vmatpush3.bf16.msra.mxu1 %v2062_v12 }
  0xee   : > { %1853 = vmatprep.subr.bf16.mxu0 %v2383_v0  ;;  %1841 = vmatprep.subr.bf16.mxu1 %v2383_v0 }
  0xf0   : > { %1826 = vmatmul.mubr.msk.bf16.vlgmr.msra.gmra.mrb[0].mxu0 %vm606_vm1, %v566_v8  ;;  %1838 = vmatmul.mubr.msk.bf16.vlgmr.msra.gmra.mrb[0].mxu1 %vm606_vm1, %v650_v13 }
  0xf1   : > { %1855 = vmatprep.mubr.msk.bf16.mxu0 %vm2384_vm0, %v2383_v0  ;;  %1843 = vmatprep.mubr.msk.bf16.mxu1 %vm2384_vm0, %v2383_v0 }
 0x1c3   : > { %v644_v15 = vpop.f32.mrb[0].mxu0  ;;  %v727_v21 = vpop.f32.mrb[0].mxu1 }
 0x1c4   : > { %v645_v16 = vadd.f32 %v1735_v14, %v644_v15  ;;  %v1827_v17 = vpop.f32.mrb[1].mxu0  ;;  %v1839_v22 = vpop.f32.mrb[1].mxu1  ;;  %v728_v26 = vadd.f32 %v1741_v25, %v727_v21 }
 0x1c5   : > { %v647_v18 = vpop.f32.mrb[2].mxu0  ;;  %v730_v23 = vpop.f32.mrb[2].mxu1 }
 0x1c6   : > { %v2781_v19 = vpack.c.bf16 %v645_v16, %v645_v16  ;;  %v1828_v20 = vpop.f32.mrb[3].mxu0  ;;  %v1840_v24 = vpop.f32.mrb[3].mxu1  ;;  %v2791_v29 = vpack.c.bf16 %v728_v26, %v728_v26 }
 0x1c8   : > { %855 = vrot.lane.b32.xlu1 %v2781_v19, %s2385_s18  ;;  %744 = vrot.lane.b32.xlu0 %v2781_v19, %s2386_s29  ;;  %v812_v32 = vsel %vm810_vm3, %v2791_v29, 0  ;;  %s554_s29 = scalar_lea.vmem [#allocation13], %s2724_s6 }
 0x1cc   : > { %857 = vrot.lane.b32.xlu0 %v2781_v19, %s2387_s20  ;;  %s1770_s20 = sshll.u32 %s2486_s14, 7 }
 0x23a   : > { %v745_v27 = vpop.permute.xlu0 %744  ;;  %v856_v33 = vpop.permute.xlu1 %855 }
 0x23b   : > { %v751_v28 = vsel %vm746_vm2, %v745_v27, 0 }
 0x23c   : > { %1842 = vmatpush3.bf16.xpose.msra.mxu1 %v751_v28 }
 0x23d   : > { %1847 = vmatprep.subr.bf16.mxu1 %v2383_v0 }
 0x23e   : > { %v858_v30 = vpop.permute.xlu0 %857 }
 0x23f   : > { %v863_v31 = vsel %vm746_vm2, %v858_v30, 0 }
 0x240   : > { %1854 = vmatpush3.bf16.xpose.msra.mxu0 %v863_v31 }
 0x241   : > { %1865 = vmatprep.subr.bf16.mxu0 %v2383_v0 }
 0x243   : > { %1844 = vmatmul.mubr.msk.bf16.vlgmr.msra.gmra.mrb[4].mxu1 %vm746_vm2, %v2781_v19 }
 0x244   : > { %1848 = vmatpush3.bf16.msra.mxu1 %v812_v32  ;;  %1849 = vmatprep.mubr.msk.bf16.mxu1 %vm2384_vm0, %v2383_v0 }
 0x245   : > { %1859 = vmatprep.subr.bf16.mxu1 %v2383_v0 }
 0x247   : > { %1856 = vmatmul.mubr.msk.bf16.vlgmr.msra.gmra.mrb[4].mxu0 %vm746_vm2, %v856_v33 }
 0x248   : > { %1867 = vmatprep.mubr.msk.bf16.mxu0 %vm2384_vm0, %v2383_v0  ;;  %1866 = vmatpush3.bf16.msra.mxu0 %v2064_v6  ;;  %v2066_v6 = vld [vmem:[#allocation10 + $0x18] sm:$0xff]  }
 0x249   : > { %1877 = vmatprep.subr.bf16.mxu0 %v2383_v0 }
 0x316   : > { %v787_v34 = vpop.f32.mrb[4].mxu1 }
 0x317   : > { %v793_v35 = vmul.f32 0.25, %v787_v34  ;;  %v1845_v36 = vpop.f32.mrb[5].mxu1 }
 0x318   : > { %v790_v37 = vpop.f32.mrb[6].mxu1 }
 0x319   : > { %v1846_v38 = vpop.f32.mrb[7].mxu1  ;;  %v795_v39 = vsel %vm794_vm4, %v793_v35, -inf }
 0x31a   : > { %796 = vmax.xlane.f32.xlu1 %v795_v39  ;;  %v899_v40 = vpop.f32.mrb[4].mxu0 }
 0x31b   : > { %v905_v41 = vmul.f32 0.25, %v899_v40  ;;  %v1857_v42 = vpop.f32.mrb[5].mxu0 }
 0x31c   : > { %v902_v43 = vpop.f32.mrb[6].mxu0 }
 0x31d   : > { %v1858_v44 = vpop.f32.mrb[7].mxu0  ;;  %v906_v45 = vsel %vm794_vm4, %v905_v41, -inf }
 0x31e   : > { %907 = vmax.xlane.f32.xlu0 %v906_v45 }
 0x3a7   : > { %v797_v46 = vpop.xlane.xlu1 %796 }
 0x3a8   : > { %v798_v47 = vsub.f32 %v793_v35, %v797_v46 }
 0x3aa   : > { %v799_v48 = vmul.f32 1.442695, %v798_v47 }
 0x3ab   : > { %v908_v49 = vpop.xlane.xlu0 %907 }
 0x3ac   : > { %2067 = vpow2.f32 %v799_v48  ;;  %v909_v50 = vsub.f32 %v905_v41, %v908_v49 }
 0x3ae   : > { %v910_v51 = vmul.f32 1.442695, %v909_v50 }
 0x3b0   : > { %2069 = vpow2.f32 %v910_v51 }
 0x3b6   : > { %v2068_v52 = vpop.eup %2067 }
 0x3b7   : > { %v801_v53 = vsel %vm794_vm4, %v2068_v52, 0.0 }
 0x3b8   : > { %802 = vadd.xlane.f32.xlu0 %v801_v53 }
 0x3ba   : > { %v2070_v54 = vpop.eup %2069 }
 0x3bb   : > { %v912_v55 = vsel %vm794_vm4, %v2070_v54, 0.0 }
 0x3bc   : > { %913 = vadd.xlane.f32.xlu1 %v912_v55 }
 0x3cd   : > { %1068 = vrot.lane.b32.xlu1 %v2781_v19, %s2388_s4  ;;  %s3017_s4 = sld [smem:[#allocation31_spill]] }
 0x3ce   : > { %919 = vrot.lane.b32.xlu0 %v2791_v29, %s2385_s18  ;;  %s3016_s18 = sld [smem:[#allocation28_spill]] }
 0x3d1   : > { %1066 = vrot.lane.b32.xlu1 %v2781_v19, %s2389_s17 }
 0x445   : > { %v803_v56 = vpop.xlane.xlu0 %802 }
 0x446   : > { %2071 = vrcp.f32 %v803_v56 }
 0x449   : > { %v914_v57 = vpop.xlane.xlu1 %913  ;;  %v920_v60 = vpop.permute.xlu0 %919 }
 0x44a   : > { %2073 = vrcp.f32 %v914_v57  ;;  %v925_v63 = vsel %vm810_vm3, %v920_v60, 0 }
 0x44d   : > { %v1069_v12 = vpop.permute.xlu1 %1068 }
 0x44e   : > { %v1074_v17 = vsel %vm746_vm2, %v1069_v12, 0 }
 0x450   : > { %v2072_v58 = vpop.eup %2071 }
 0x451   : > { %v805_v59 = vmul.f32 %v2072_v58, %v2068_v52  ;;  %v1067_v20 = vpop.permute.xlu1 %1066 }
 0x453   : > { %v806_v61 = vpack.c.bf16 %v805_v59, %v805_v59 }
 0x454   : > { %v2074_v62 = vpop.eup %2073 }
 0x455   : > { %1850 = vmatmul.mubr.msk.bf16.vlgmr.msra.gmra.mrb[8].mxu1 %vm794_vm4, %v806_v61  ;;  %v916_v1 = vmul.f32 %v2074_v62, %v2070_v54 }
 0x456   : > { %1860 = vmatpush3.bf16.msra.mxu1 %v925_v63  ;;  %1861 = vmatprep.mubr.msk.bf16.mxu1 %vm2384_vm0, %v2383_v0 }
 0x457   : > { %1871 = vmatprep.subr.bf16.mxu1 %v2383_v0  ;;  %v917_v2 = vpack.c.bf16 %v916_v1, %v916_v1 }
 0x45d   : > { %1862 = vmatmul.mubr.msk.bf16.vlgmr.msra.gmra.mrb[12].mxu1 %vm794_vm4, %v917_v2 }
 0x45e   : > { %1873 = vmatprep.mubr.msk.bf16.mxu1 %vm2384_vm0, %v2383_v0  ;;  %1872 = vmatpush3.bf16.msra.mxu1 %v2063_v3 }
 0x45f   : > { %1883 = vmatprep.subr.bf16.mxu1 %v2383_v0 }
 0x528   : > { %v848_v7 = vpop.f32.mrb[8].mxu1 }
 0x529   : > { %v854_v8 = vpack.c.bf16 %v848_v7, %v848_v7  ;;  %v1851_v9 = vpop.f32.mrb[9].mxu1 }
 0x52a   : > { %v851_v10 = vpop.f32.mrb[10].mxu1 }
 0x52b   : > { %v1852_v11 = vpop.f32.mrb[11].mxu1  ;;  %1874 = vmatmul.mubr.msk.bf16.vlgmr.msra.gmra.mrb[16].mxu1 %vm746_vm2, %v854_v8 }
 0x52c   : > { %1885 = vmatprep.mubr.msk.bf16.mxu1 %vm2384_vm0, %v2383_v0 }
 0x530   : > { %v961_v13 = vpop.f32.mrb[12].mxu1 }
 0x531   : > { %v967_v14 = vpack.c.bf16 %v961_v13, %v961_v13  ;;  %v1863_v15 = vpop.f32.mrb[13].mxu1 }
 0x532   : > { %v964_v16 = vpop.f32.mrb[14].mxu1 }
 0x533   : > { %v1864_v18 = vpop.f32.mrb[15].mxu1  ;;  %1868 = vmatmul.mubr.msk.bf16.vlgmr.msra.gmra.mrb[8].mxu0 %vm746_vm2, %v967_v14 }
 0x534   : > { %1878 = vmatpush3.bf16.xpose.msra.mxu0 %v1074_v17  ;;  %1879 = vmatprep.mubr.msk.bf16.mxu0 %vm2384_vm0, %v2383_v0 }
 0x535   : > { %1889 = vmatprep.subr.bf16.mxu0 %v2383_v0 }
 0x53b   : > { %1880 = vmatmul.mubr.msk.bf16.vlgmr.msra.gmra.mrb[12].mxu0 %vm746_vm2, %v1067_v20 }
 0x53c   : > { %1891 = vmatprep.mubr.msk.bf16.mxu0 %vm2384_vm0, %v2383_v0 }
 0x5fe   : > { %v1060_v21 = vpop.f32.mrb[16].mxu1 }
 0x5ff   : > { %v1875_v22 = vpop.f32.mrb[17].mxu1 }
 0x600   : > { %v1063_v23 = vpop.f32.mrb[18].mxu1 }
 0x601   : > { %v1876_v24 = vpop.f32.mrb[19].mxu1 }
 0x606   : > { %v1011_v25 = vpop.f32.mrb[8].mxu0 }
 0x607   : > { %v2836_v26 = vadd.f32 %v1060_v21, %v1011_v25  ;;  %v1869_v27 = vpop.f32.mrb[9].mxu0 }
 0x608   : > { %v1014_v28 = vpop.f32.mrb[10].mxu0  ;;  %v1763_v27 = vld [vmem:[%s2971_s7] ss:$0 sm:$0xff] }
 0x609   : > { %v1870_v30 = vpop.f32.mrb[11].mxu0 }
 0x60e   : > { %v1110_v31 = vpop.f32.mrb[12].mxu0 }
 0x60f   : > { %v1116_v32 = vmul.f32 0.25, %v1110_v31  ;;  %v1881_v33 = vpop.f32.mrb[13].mxu0 }
 0x610   : > { %v1113_v34 = vpop.f32.mrb[14].mxu0 }
 0x611   : > { %v1882_v35 = vpop.f32.mrb[15].mxu0  ;;  %v1117_v36 = vsel %vm794_vm4, %v1116_v32, -inf }
 0x612   : > { %1118 = vmax.xlane.f32.xlu0 %v1117_v36 }
 0x628   : > { %1129 = vrot.lane.b32.xlu0 %v2791_v29, %s2389_s17  ;;  %s2891_s17 = scalar_lea.hbm %s3017_s4, %s1770_s20 }
 0x62c   : > { %1228 = vrot.lane.b32.xlu0 %v2781_v19, %s2390_s13 }
 0x69f   : > { %v1119_v37 = vpop.xlane.xlu0 %1118 }
 0x6a0   : > { %v1120_v38 = vsub.f32 %v1116_v32, %v1119_v37  ;;  %v1431_v37 = vld [vmem:[#allocation11] sm:$0xff] }
 0x6a2   : > { %v1121_v39 = vmul.f32 1.442695, %v1120_v38  ;;  %v1432_v38 = vld [vmem:[#allocation11 + $0x8] sm:$0xff] }
 0x6a3   : > { %v1130_v40 = vpop.permute.xlu0 %1129 }
 0x6a4   : > { %2075 = vpow2.f32 %v1121_v39  ;;  %v1135_v41 = vsel %vm810_vm3, %v1130_v40, 0  ;;  %v1933_v39 = vpack.c.bf16 %v1432_v38, %v1431_v37  ;;  %v2392_v40 = vmov 0.0|0.0  }
 0x6a5   : > { %1884 = vmatpush3.bf16.msra.mxu1 %v1135_v41  ;;  %v1434_v41 = vld [vmem:[#allocation11 + $0x18] sm:$0xff] }
 0x6a6   : > { %1895 = vmatprep.subr.bf16.mxu1 %v2383_v0 }
 0x6a7   : > { %v1229_v50 = vpop.permute.xlu0 %1228 }
 0x6ae   : > { %v2076_v42 = vpop.eup %2075 }
 0x6af   : > { %v1123_v43 = vsel %vm794_vm4, %v2076_v42, 0.0 }
 0x6b0   : > { %1124 = vadd.xlane.f32.xlu1 %v1123_v43  ;;  %v1435_v43 = vld [vmem:[#allocation11 + $0x20] sm:$0xff] }
 0x6c1   : > { %1230 = vrot.lane.b32.xlu1 %v2781_v19, %s2391_s8  ;;  %v2065_v19 = vld [vmem:[#allocation10 + $0x10] sm:$0xff]   ;;  %s1521_s8 = scalar_lea.sflag [#allocation4], %s2721_s16 }
 0x6c2   : > { %1890 = vmatpush3.bf16.msra.mxu0 %v2065_v19 }
 0x6c3   : > { %1901 = vmatprep.subr.bf16.mxu0 %v2383_v0 }
 0x73d   : > { %v1125_v44 = vpop.xlane.xlu1 %1124 }
 0x73e   : > { %2077 = vrcp.f32 %v1125_v44  ;;  %v1436_v44 = vld [vmem:[#allocation11 + $0x28] sm:$0xff] }
 0x741   : > { %v1231_v47 = vpop.permute.xlu1 %1230 }
 0x742   : > { %v1236_v49 = vsel %vm746_vm2, %v1231_v47, 0  ;;  %v1438_v47 = vld [vmem:[#allocation11 + $0x38] sm:$0xff] }
 0x748   : > { %v2078_v45 = vpop.eup %2077 }
 0x749   : > { %v1127_v46 = vmul.f32 %v2078_v45, %v2076_v42  ;;  %v1939_v45 = vpack.c.bf16 %v1436_v44, %v1435_v43 }
 0x74b   : > { %v1128_v48 = vpack.c.bf16 %v1127_v46, %v1127_v46  ;;  %v1437_v46 = vld [vmem:[#allocation11 + $0x30] sm:$0xff] }
 0x74d   : > { %1886 = vmatmul.mubr.msk.bf16.vlgmr.msra.gmra.mrb[20].mxu1 %vm794_vm4, %v1128_v48  ;;  %v1942_v48 = vpack.c.bf16 %v1438_v47, %v1437_v46 }
 0x74e   : > { %1896 = vmatpush3.bf16.xpose.msra.mxu1 %v1236_v49  ;;  %1897 = vmatprep.mubr.msk.bf16.mxu1 %vm2384_vm0, %v2383_v0 }
 0x74f   : > { %1907 = vmatprep.subr.bf16.mxu1 %v2383_v0 }
 0x755   : > { %1898 = vmatmul.mubr.msk.bf16.vlgmr.msra.gmra.mrb[24].mxu1 %vm746_vm2, %v1229_v50 }
 0x756   : > { %1909 = vmatprep.mubr.msk.bf16.mxu1 %vm2384_vm0, %v2383_v0  ;;  %1908 = vmatpush3.bf16.msra.mxu1 %v2066_v6 }
 0x820   : > { %v1171_v51 = vpop.f32.mrb[20].mxu1 }
 0x821   : > { %v1177_v52 = vpack.c.bf16 %v1171_v51, %v1171_v51  ;;  %v1887_v53 = vpop.f32.mrb[21].mxu1 }
 0x822   : > { %v1174_v54 = vpop.f32.mrb[22].mxu1 }
 0x823   : > { %v1888_v55 = vpop.f32.mrb[23].mxu1  ;;  %1892 = vmatmul.mubr.msk.bf16.vlgmr.msra.gmra.mrb[16].mxu0 %vm746_vm2, %v1177_v52  ;;  %v1764_v52 = vld [vmem:[%s3015_s22] ss:$0 sm:$0xff] }
 0x824   : > { %1903 = vmatprep.mubr.msk.bf16.mxu0 %vm2384_vm0, %v2383_v0  ;;  %v1765_v54 = vld [vmem:[%s3016_s18] ss:$0 sm:$0xff] }
 0x828   : > { %v1272_v56 = vpop.f32.mrb[24].mxu1 }
 0x829   : > { %v1278_v57 = vmul.f32 0.25, %v1272_v56  ;;  %v1899_v58 = vpop.f32.mrb[25].mxu1 }
 0x82a   : > { %v1275_v59 = vpop.f32.mrb[26].mxu1 }
 0x82b   : > { %v1900_v60 = vpop.f32.mrb[27].mxu1  ;;  %v1279_v61 = vsel %vm794_vm4, %v1278_v57, -inf }
 0x82c   : > { %1280 = vmax.xlane.f32.xlu1 %v1279_v61 }
 0x8b9   : > { %v1281_v62 = vpop.xlane.xlu1 %1280 }
 0x8ba   : > { %v1282_v63 = vsub.f32 %v1278_v57, %v1281_v62 }
 0x8bc   : > { %v1283_v1 = vmul.f32 1.442695, %v1282_v63 }
 0x8be   : > { %2079 = vpow2.f32 %v1283_v1 }
 0x8c8   : > { %v2080_v2 = vpop.eup %2079 }
 0x8c9   : > { %v1285_v3 = vsel %vm794_vm4, %v2080_v2, 0.0 }
 0x8ca   : > { %1286 = vadd.xlane.f32.xlu0 %v1285_v3 }
 0x8e0   : > { %1291 = vrot.lane.b32.xlu0 %v2791_v29, %s2390_s13  ;;  %s1539_s13 = sshll.u32 %s554_s29, 4  ;;  %s1540_s13 = int_to_ptr.vmem [resolvable:$true] %s1539_s13 }
 0x8e1   : > { %s2257_s30 = scalar_lea.vmem %s1540_s13, 128  ;;  %p2264_p5 = scmp.lt.s32.totalorder %s1540_s13, %s2262_s15 }
 0x8e2   : > { %p2258_p0 = scmp.ne.s32.totalorder %s1540_s13, %s2257_s30  ;;  %p2265_p7 = scmp.lt.s32.totalorder %s2263_s12, %s2257_s30 }
 0x8e4   : > { %p2259_p4 = pnand %p2258_p0, %p3018_p2  ;;  %p2266_p8 = por %p2265_p7, %p2264_p5 }
 0x8e6   : > { %p2260_p10 = pneg %p2259_p4 }
 0x8e8   : > { %p2267_p6 = pnand %p2266_p8, %p2260_p10 }
 0x8f6   : > { %v1221_v7 = vpop.f32.mrb[16].mxu0 }
 0x8f7   : > { %v1227_v8 = vadd.f32 %v1221_v7, %v2836_v26  ;;  %v1893_v9 = vpop.f32.mrb[17].mxu0 }
 0x8f8   : > { %v1224_v10 = vpop.f32.mrb[18].mxu0 }
 0x8f9   : > { %v1894_v11 = vpop.f32.mrb[19].mxu0 }
 0x957   : > { %v1287_v12 = vpop.xlane.xlu0 %1286 }
 0x958   : > { %2081 = vrcp.f32 %v1287_v12 }
 0x95b   : > { %v1292_v13 = vpop.permute.xlu0 %1291 }
 0x95c   : > { %v1297_v14 = vsel %vm810_vm3, %v1292_v13, 0 }
 0x95d   : > { %1902 = vmatpush3.bf16.msra.mxu0 %v1297_v14 }
 0x95e   : > { %1932 = vmatprep.subr.bf16.mxu0 %v2392_v40 }
 0x962   : > { %v2082_v15 = vpop.eup %2081 }
 0x963   : > { %v1289_v16 = vmul.f32 %v2082_v15, %v2080_v2 }
 0x965   : > { %v1290_v17 = vpack.c.bf16 %v1289_v16, %v1289_v16 }
 0x967   : > { %1904 = vmatmul.mubr.msk.bf16.vlgmr.msra.gmra.mrb[20].mxu0 %vm794_vm4, %v1290_v17 }
 0x968   : > { %1929 = vmatprep.mubr.msk.f32.mxu0 %vm2384_vm0, %v2383_v0  ;;  %1934 = vmatpush3.bf16.msra.mxu0 %v1933_v39 }
 0x969   : > { %1935 = vmatprep.subr.bf16.mxu0 %v2392_v40 }
 0xa3a   : > { %v1333_v29 = vpop.f32.mrb[20].mxu0 }
 0xa3b   : > { %v1339_v18 = vpack.c.bf16 %v1333_v29, %v1333_v29  ;;  %v1905_v20 = vpop.f32.mrb[21].mxu0 }
 0xa3c   : > { %v1336_v21 = vpop.f32.mrb[22].mxu0 }
 0xa3d   : > { %v1906_v22 = vpop.f32.mrb[23].mxu0  ;;  %1910 = vmatmul.mubr.msk.bf16.vlgmr.msra.gmra.mrb[28].mxu1 %vm746_vm2, %v1339_v18 }
 0xb10   : > { %v1383_v23 = vpop.f32.mrb[28].mxu1 }
 0xb11   : > { %v1389_v24 = vadd.f32 %v1383_v23, %v1227_v8  ;;  %v1911_v25 = vpop.f32.mrb[29].mxu1 }
 0xb12   : > { %v1386_v26 = vpop.f32.mrb[30].mxu1 }
 0xb13   : > { %v1390_v28 = vadd.f32 %v1389_v24, %v2757_v4  ;;  %v1912_v30 = vpop.f32.mrb[31].mxu1  ;;  %v1433_v4 = vld [vmem:[#allocation11 + $0x10] sm:$0xff] }
 0xb14   : > { %v1936_v42 = vpack.c.bf16 %v1434_v41, %v1433_v4 }
 0xb15   : > { %v1398_v31 = vadd.f32 %v1763_v27, %v1390_v28 }
 0xb16   : > { %1937 = vmatpush3.bf16.msra.mxu0 %v1936_v42 }
 0xb17   : > { %v1399_v0 = vsel %vm606_vm1, %v1398_v31, 0.0  ;;  %1938 = vmatprep.subr.bf16.mxu0 %v2392_v40 }
 0xb18   : > { %1400 = vadd.xlane.f32.xlu1 %v1399_v0 }
 0xb1a   : > { %1940 = vmatpush3.bf16.msra.mxu0 %v1939_v45 }
 0xb1b   : > { %1941 = vmatprep.subr.bf16.mxu0 %v2392_v40 }
 0xb1e   : > { %1943 = vmatpush3.bf16.msra.mxu0 %v1942_v48 }
 0xba5   : > { %v1401_v32 = vpop.xlane.xlu1 %1400 }
 0xba6   : > { %v1403_v33 = vmul.f32 0.015625, %v1401_v32 }
 0xba8   : > { %v1404_v34 = vsub.f32 %v1398_v31, %v1403_v33 }
 0xbaa   : > { %v1405_v35 = vmul.f32 %v1404_v34, %v1404_v34 }
 0xbac   : > { %v1406_v36 = vsel %vm606_vm1, %v1405_v35, 0.0 }
 0xbad   : > { %1407 = vadd.xlane.f32.xlu1 %v1406_v36 }
 0xc3a   : > { %v1408_v49 = vpop.xlane.xlu1 %1407 }
 0xc3b   : > { %v1409_v50 = vmul.f32 0.015625, %v1408_v49 }
 0xc3d   : > { %v1410_v19 = vadd.f32 1e-05, %v1409_v50 }
 0xc3f   : > { %2083 = vrsqrt.f32 %v1410_v19 }
 0xc49   : > { %v2084_v51 = vpop.eup %2083 }
 0xc4a   : > { %v1412_v53 = vmul.f32 %v2084_v51, %v1404_v34 }
 0xc4c   : > { %v1420_v55 = vmul.f32 %v1764_v52, %v1412_v53 }
 0xc4e   : > { %v1428_v56 = vadd.f32 %v1765_v54, %v1420_v55 }
 0xc50   : > { %v1430_v57 = vadd.f32 %v1428_v56, %v2759_v5  ;;  %1429 = vst.msk [vmem:[%s554_s29] sm:$0xff] %vm606_vm1, %v1428_v56 }
 0xc52   : > { %1930 = vmatmul.mubr.msk.f32.vlgmr.msra.gmra.mrb[24].mxu0 %vm606_vm1, %v1430_v57 }
 0xc53   : > { %2270 = shalt.err (!%p2267_p6)
}
 0xc54   : > { %s2271_s22 = scalar_lea.hbm %s2891_s17, 128  ;;  %s2275_s18 = scalar_lea.hbm %s3017_s4, 256 }
 0xc55   : > { %p2272_p11 = scmp.ne.s32.totalorder %s2891_s17, %s2271_s22  ;;  %p2276_p12 = scmp.lt.u32.totalorder %s2891_s17, %s3017_s4 }
 0xc56   : > { %p2277_p3 = scmp.lt.u32.totalorder %s2275_s18, %s2271_s22  ;;  %p2279_p0 = scmp.lt.u32.totalorder %s2271_s22, %s2891_s17 }
 0xc57   : > { %p2273_p1 = pnand %p2272_p11, %p3018_p2 }
 0xc58   : > { %p2278_p13 = por %p2277_p3, %p2276_p12 }
 0xc59   : > { %p2274_p9 = pneg %p2273_p1 }
 0xc5a   : > { %p2280_p4 = por %p2279_p0, %p2278_p13 }
 0xc5c   : > { %p2281_p10 = pnand %p2280_p4, %p2274_p9 }
 0xc5e   : > { %2284 = shalt.err (!%p2281_p10)
}
 0xc5f   : > { %1964 = dma.vmem_to_hbm [thread:$0]  (%p3018_p2), %s1540_s13, 128, %s2891_s17, %s1521_s8  }
 0xc60   : > { %s3019_s2 = sld [smem:[#allocation30_spill]]  ;;  %s561_s15 = scalar_lea.vmem [#allocation14], %s2724_s6 }
 0xc61   : > { %s1552_s12 = sshll.u32 %s561_s15, 4  ;;  %s3020_s10 = sld [smem:[#allocation32_spill]]  ;;  %s2922_s12 = int_to_ptr.vmem [resolvable:$true] %s1552_s12 }
 0xc62   : > { %s1526_s17 = scalar_lea.sflag [#allocation15], %s2721_s16  ;;  %s2285_s13 = scalar_lea.vmem %s2922_s12, 128 }
 0xc63   : > { %p2286_p5 = scmp.ne.s32.totalorder %s2922_s12, %s2285_s13  ;;  %s2394_s6 = smov [#allocation14]  }
 0xc64   : > { %s2289_s8 = sshll.u32 %s2394_s6, 4  ;;  %s2290_s8 = int_to_ptr.vmem [resolvable:$false] %s2289_s8 }
 0xc65   : > { %p2287_p7 = pnand %p2286_p5, %p3018_p2  ;;  %s2291_s14 = scalar_lea.vmem %s2290_s8, 256 }
 0xc66   : > { %v1766_v5 = vld [vmem:[%s3019_s2] ss:$0 sm:$0xff]  ;;  %p2292_p6 = scmp.lt.s32.totalorder %s2922_s12, %s2290_s8  ;;  %p2293_p11 = scmp.lt.s32.totalorder %s2291_s14, %s2285_s13 }
 0xc67   : > { %s2920_s18 = scalar_lea.hbm %s3020_s10, %s1770_s20  ;;  %p2288_p8 = pneg %p2287_p7 }
 0xc68   : > { %p2294_p1 = por %p2293_p11, %p2292_p6 }
 0xc6a   : > { %p2295_p9 = pnand %p2294_p1, %p2288_p8 }
 0xd25   : > { %v1515_v58 = vpop.f32.mrb[24].mxu0 }
 0xd26   : > { %v1516_v59 = vadd.f32 %v1766_v5, %v1515_v58  ;;  %v1931_v60 = vpop.f32.mrb[25].mxu0 }
 0xd28   : > { %1519 = vst [vmem:[%s561_s15] sm:$0xff] %v1516_v59 }
 0xd29   : > { %2298 = shalt.err (!%p2295_p9)
}
 0xd2a   : > { %s2299_s16 = scalar_lea.hbm %s2920_s18, 128  ;;  %s2303_s23 = scalar_lea.hbm %s3020_s10, 256 }
 0xd2b   : > { %p2300_p12 = scmp.ne.s32.totalorder %s2920_s18, %s2299_s16  ;;  %p2304_p0 = scmp.lt.u32.totalorder %s2920_s18, %s3020_s10 }
 0xd2c   : > { %p2305_p4 = scmp.lt.u32.totalorder %s2303_s23, %s2299_s16  ;;  %p2307_p5 = scmp.lt.u32.totalorder %s2299_s16, %s2920_s18 }
 0xd2d   : > { %p2301_p3 = pnand %p2300_p12, %p3018_p2 }
 0xd2e   : > { %p2306_p10 = por %p2305_p4, %p2304_p0 }
 0xd2f   : > { %p2302_p13 = pneg %p2301_p3 }
 0xd30   : > { %p2308_p7 = por %p2307_p5, %p2306_p10 }
 0xd32   : > { %p2309_p8 = pnand %p2308_p7, %p2302_p13 }
 0xd34   : > { %2312 = shalt.err (!%p2309_p8)
}
 0xd35   : > { %1965 = dma.vmem_to_hbm [thread:$0]  (%p3018_p2), %s2922_s12, 128, %s2920_s18, %s1526_s17  }
 0xd36 PF: > { %s1564_s2 = sand.u32 1, %s2359_s25   ;;  %p3021_p6 = scmp.ne.s32.totalorder %s3005_s21, 0 }
 0xd37   : > { %p3022_p11 = scmp.ge.s32.totalorder %s2371_s28, 2  ;;  %s1565_s15 = scalar_lea.sflag [#allocation4], %s1564_s2 }
 0xd39   : > { %p1989_p1 = pnand %p3022_p11, %p3021_p6 }
 0xd3b   : > { %2350 = dma.done.wait (!%p1989_p1), %s1565_s15, 128  }
 0xd3c   : > { %2352 = vsyncadd (!%p1989_p1), %s1565_s15, 4294967168  ;;  %s1574_s22 = scalar_lea.sflag [#allocation15], %s1564_s2 }
 0xd3d   : > { %2354 = dma.done.wait (!%p1989_p1), %s1574_s22, 128  }
 0xd3e   : > { %2356 = vsyncadd (!%p1989_p1), %s1574_s22, 4294967168  ;;  %s3023_s19 = sld [smem:[#allocation23_spill]]  ;;  %p35_p2 = scmp.ge.s32.totalorder %s2614_s9, 4  }
 0xd3f   : > { %s3024_s25 = smov %s2363_s26  ;;  %s3025_s26 = smov %s2367_s27 }
 0xd40   : > { %s3027_s28 = smov %s2614_s9  ;;  %37 = sbr.rel (!%p35_p2) target bundleno = 21 (0x15), region = 159 }
 0xd44   : > { %s3026_s27 = smov %s3023_s19 }
 0xd47   :  { %1579 = vsyncpa [#allocation3], 1 }
 0xd48   :  { %1581 = vsyncpa [#allocation3 + $0x1], 1 }
 0xd49   :  { %1582 = vsyncpa [#allocation6], 1 }
 0xd4a   :  { %1584 = vsyncpa [#allocation6 + $0x1], 1 }
 0xd4b   :  { %1585 = vsyncpa [#allocation9], 1 }
 0xd4c   :  { %1586 = vsyncpa [#allocation12], 1 }
 0xd4d   :  { %1587 = vsyncpa [#allocation4], 1 }
 0xd4e   :  { %1589 = vsyncpa [#allocation4 + $0x1], 1 }
 0xd4f   :  { %1590 = vsyncpa [#allocation15], 1 }
 0xd50   :  { %1592 = vsyncpa [#allocation15 + $0x1], 1 }

</bundles_post_ra>
